<compile_context>
chip_gen: v6e
topology: v6e:2x2x1
jax: 0.10.0
libtpu: 0.0.40
codegen_flags: <defaults>
</compile_context>

<pallas_src>
import functools
import math

import jax
import jax.numpy as jnp
from jax import lax
from jax.experimental import pallas as pl
from jax.experimental.pallas import tpu as pltpu


def _attn_kernel(x_ref, wqkv_ref, bqkv_ref, wp_ref, bp_ref, o_ref, *, n_head):
    """One grid step == b_block batch elements. Everything fits in VMEM."""
    Bblk, T, C = x_ref.shape
    hd = C // n_head
    scale = 1.0 / math.sqrt(hd)

    # Fold (batch, seq) rows into the MXU M dimension; bf16 operands, f32 accum.
    x2d = x_ref[...].reshape(Bblk * T, C).astype(jnp.bfloat16)

    # Fused QKV projection: one (M, C) x (C, 3C) matmul instead of three.
    qkv = jnp.dot(x2d, wqkv_ref[...], preferred_element_type=jnp.float32)
    qkv = qkv + bqkv_ref[...]                       # (M, 3C) f32
    qkv_bf = qkv.astype(jnp.bfloat16)               # single cast, sliced below

    # Causal mask: built once per grid step, shared by all heads / batches.
    # Finite additive bias instead of -inf (robust if fully-masked rows appear).
    row = lax.broadcasted_iota(jnp.int32, (T, T), 0)
    col = lax.broadcasted_iota(jnp.int32, (T, T), 1)
    mask_bias = jnp.where(col <= row, 0.0, -1e30).astype(jnp.float32)  # (T, T)

    # Per-head attention, batched over the Bblk slab (3-D dot_general with a
    # single leading batch dim). n_head is a static Python int -> unrolls.
    y_heads = []
    for h in range(n_head):
        qh = qkv_bf[:, h * hd:(h + 1) * hd].reshape(Bblk, T, hd)
        kh = qkv_bf[:, C + h * hd:C + (h + 1) * hd].reshape(Bblk, T, hd)
        vh = qkv_bf[:, 2 * C + h * hd:2 * C + (h + 1) * hd].reshape(Bblk, T, hd)

        att = jnp.einsum("bqd,bkd->bqk", qh, kh,
                         preferred_element_type=jnp.float32) * scale
        att = att + mask_bias[None, :, :]

        # Numerically stable softmax along keys — all f32 VPU/EUP work.
        att = att - jnp.max(att, axis=-1, keepdims=True)
        e = jnp.exp(att)
        p = e * pl.reciprocal(jnp.sum(e, axis=-1, keepdims=True), approx=True)

        y_heads.append(jnp.einsum("bqk,bkd->bqd", p.astype(jnp.bfloat16), vh,
                                  preferred_element_type=jnp.float32))

    y = jnp.concatenate(y_heads, axis=-1)           # (Bblk, T, C) f32
    y2d = y.reshape(Bblk * T, C).astype(jnp.bfloat16)

    # Output projection (again M = Bblk*T rows).
    out = jnp.dot(y2d, wp_ref[...], preferred_element_type=jnp.float32)
    out = out + bp_ref[...]
    o_ref[...] = out.reshape(Bblk, T, C).astype(o_ref.dtype)


def _pick_b_block(B):
    # Amortize per-grid-step overhead while keeping >= 2 grid steps so the
    # batch axis can shard across both TensorCores on v7x.
    for cand in (16, 8, 4, 2):
        if B % cand == 0 and B // cand >= 2:
            return cand
    return 1


def causal_self_attention(x, params, n_head, *, b_block=None):
    """x: (B, T, C) float32. params: dict of (C,C) weights and (1,C) biases."""
    B, T, C = x.shape
    assert C % n_head == 0
    if b_block is None:
        b_block = _pick_b_block(B)
    assert B % b_block == 0

    # Host-side fusion / dtype prep (would be done once at param-init time in a
    # real model): fused QKV weight (C, 3C) and bias (1, 3C); bf16 MXU weights.
    wqkv = jnp.concatenate([params["wq"], params["wk"], params["wv"]],
                           axis=1).astype(jnp.bfloat16)
    bqkv = jnp.concatenate([params["bq"], params["bk"], params["bv"]],
                           axis=1).astype(jnp.float32)
    wp = params["wp"].astype(jnp.bfloat16)
    bp = params["bp"].astype(jnp.float32)

    kernel = functools.partial(_attn_kernel, n_head=n_head)

    return pl.pallas_call(
        kernel,
        out_shape=jax.ShapeDtypeStruct((B, T, C), x.dtype),
        grid_spec=pltpu.PrefetchScalarGridSpec(
            num_scalar_prefetch=0,
            grid=(B // b_block,),
            in_specs=[
                pl.BlockSpec((b_block, T, C), lambda b: (b, 0, 0)),   # x
                pl.BlockSpec((C, 3 * C), lambda b: (0, 0)),           # Wqkv (bf16)
                pl.BlockSpec((1, 3 * C), lambda b: (0, 0)),           # bqkv
                pl.BlockSpec((C, C), lambda b: (0, 0)),               # Wp (bf16)
                pl.BlockSpec((1, C), lambda b: (0, 0)),               # bp
            ],
            out_specs=pl.BlockSpec((b_block, T, C), lambda b: (b, 0, 0)),
        ),
        compiler_params=pltpu.CompilerParams(
            dimension_semantics=("parallel",)),
    )(x, wqkv, bqkv, wp, bp)


def _reference(x, params, n_head):
    """Pure-JAX f32 reference mirroring the PyTorch forward (attention_mask=None)."""
    B, T, C = x.shape
    hd = C // n_head

    def lin(x_, w, b):
        return x_ @ w + b

    q = lin(x, params["wq"], params["bq"]).reshape(B, T, n_head, hd).transpose(0, 2, 1, 3)
    k = lin(x, params["wk"], params["bk"]).reshape(B, T, n_head, hd).transpose(0, 2, 1, 3)
    v = lin(x, params["wv"], params["bv"]).reshape(B, T, n_head, hd).transpose(0, 2, 1, 3)

    att = jnp.einsum("bhqd,bhkd->bhqk", q, k) / math.sqrt(hd)
    mask = jnp.tril(jnp.ones((T, T)))[None, None]
    att = jnp.where(mask == 0, -jnp.inf, att)
    att = jax.nn.softmax(att, axis=-1)
    y = jnp.einsum("bhqk,bhkd->bhqd", att, v)
    y = y.transpose(0, 2, 1, 3).reshape(B, T, C)
    return lin(y, params["wp"], params["bp"])


if __name__ == "__main__":
    # Config consistent with the module: n_embd=32, n_head=4, block_size >= T.
    # B=8 so the kernel exercises both multi-batch-per-step blocking and a
    # grid of >= 2 steps (megacore-friendly).
    B, T, C, n_head = 8, 8, 32, 4

    key = jax.random.PRNGKey(0)
    keys = jax.random.split(key, 9)

    params = {
        "wq": 0.02 * jax.random.normal(keys[0], (C, C), jnp.float32),
        "bq": 0.02 * jax.random.normal(keys[1], (1, C), jnp.float32),
        "wk": 0.02 * jax.random.normal(keys[2], (C, C), jnp.float32),
        "bk": 0.02 * jax.random.normal(keys[3], (1, C), jnp.float32),
        "wv": 0.02 * jax.random.normal(keys[4], (C, C), jnp.float32),
        "bv": 0.02 * jax.random.normal(keys[5], (1, C), jnp.float32),
        "wp": 0.02 * jax.random.normal(keys[6], (C, C), jnp.float32),
        "bp": 0.02 * jax.random.normal(keys[7], (1, C), jnp.float32),
    }
    x = jax.random.normal(keys[8], (B, T, C), jnp.float32)

    out = causal_self_attention(x, params, n_head)
    out = jax.block_until_ready(out)

    ref = _reference(x, params, n_head)
    assert out.shape == (B, T, C)
    # bf16 MXU inputs + approx reciprocal -> loosened tolerance vs f32 reference.
    max_err = float(jnp.max(jnp.abs(out - ref)))
    assert jnp.allclose(out, ref, atol=1e-2, rtol=1e-2), (
        f"mismatch vs reference (max abs err {max_err})")

    print("KERNEL_OK")
</pallas_src>

<mosaic_0001>
module attributes {stable_mosaic.version = 11 : i64} {
  func.func @_attn_kernel(%arg0: i32, %arg1: memref<4x8x32xf32, #tpu.memory_space<vmem>>, %arg2: memref<32x96xbf16, #tpu.memory_space<vmem>>, %arg3: memref<1x96xf32, #tpu.memory_space<vmem>>, %arg4: memref<32x32xbf16, #tpu.memory_space<vmem>>, %arg5: memref<1x32xf32, #tpu.memory_space<vmem>>, %arg6: memref<4x8x32xf32, #tpu.memory_space<vmem>>) attributes {dimension_semantics = [#tpu.dimension_semantics<parallel>], iteration_bounds = array<i64: 2>, scalar_prefetch = 0 : i64, scratch_operands = 0 : i64, tpu.core_type = #tpu.core_type<tc>, window_params = [{transform_indices = @transform_0, window_bounds = array<i64: 4, 8, 32>}, {pipeline_mode = #tpu.pipeline_mode<synchronous>, transform_indices = @transform_1, window_bounds = array<i64: 32, 96>}, {pipeline_mode = #tpu.pipeline_mode<synchronous>, transform_indices = @transform_2, window_bounds = array<i64: 1, 96>}, {pipeline_mode = #tpu.pipeline_mode<synchronous>, transform_indices = @transform_3, window_bounds = array<i64: 32, 32>}, {pipeline_mode = #tpu.pipeline_mode<synchronous>, transform_indices = @transform_4, window_bounds = array<i64: 1, 32>}, {transform_indices = @transform_5, window_bounds = array<i64: 4, 8, 32>}]} {
    %c0 = arith.constant 0 : index
    %c0_0 = arith.constant 0 : index
    %c0_1 = arith.constant 0 : index
    %0 = vector.load %arg1[%c0, %c0_0, %c0_1] : memref<4x8x32xf32, #tpu.memory_space<vmem>>, vector<4x8x32xf32>
    %1 = vector.shape_cast %0 : vector<4x8x32xf32> to vector<32x32xf32>
    %2 = arith.truncf %1 : vector<32x32xf32> to vector<32x32xbf16>
    %c0_2 = arith.constant 0 : index
    %c0_3 = arith.constant 0 : index
    %3 = vector.load %arg2[%c0_2, %c0_3] : memref<32x96xbf16, #tpu.memory_space<vmem>>, vector<32x96xbf16>
    %cst = arith.constant dense<0.000000e+00> : vector<32x96xf32>
    %4 = tpu.matmul %2, %3, %cst {dimension_numbers = #tpu.dot_dimension_numbers<[1], [0], [0], [1], [0, 0, 1, 1], [], []>} : vector<32x32xbf16>, vector<32x96xbf16>, vector<32x96xf32> -> vector<32x96xf32>
    %c0_4 = arith.constant 0 : index
    %c0_5 = arith.constant 0 : index
    %5 = vector.load %arg3[%c0_4, %c0_5] : memref<1x96xf32, #tpu.memory_space<vmem>>, vector<1x96xf32>
    %6 = vector.broadcast %5 : vector<1x96xf32> to vector<32x96xf32>
    %7 = arith.addf %4, %6 : vector<32x96xf32>
    %8 = arith.truncf %7 : vector<32x96xf32> to vector<32x96xbf16>
    %9 = tpu.iota {dimensions = array<i32: 0>} : vector<8x8xi32>
    %10 = tpu.iota {dimensions = array<i32: 1>} : vector<8x8xi32>
    %11 = arith.cmpi sle, %10, %9 : vector<8x8xi32>
    %cst_6 = arith.constant 0.000000e+00 : f32
    %cst_7 = arith.constant -1.000000e+30 : f32
    %12 = vector.broadcast %cst_6 : f32 to vector<8x8xf32>
    %13 = vector.broadcast %cst_7 : f32 to vector<8x8xf32>
    %14 = arith.select %11, %12, %13 : vector<8x8xi1>, vector<8x8xf32>
    %15 = vector.extract_strided_slice %8 {offsets = [0, 0], sizes = [32, 8], strides = [1, 1]} : vector<32x96xbf16> to vector<32x8xbf16>
    %16 = vector.shape_cast %15 : vector<32x8xbf16> to vector<4x8x8xbf16>
    %17 = vector.extract_strided_slice %8 {offsets = [0, 32], sizes = [32, 8], strides = [1, 1]} : vector<32x96xbf16> to vector<32x8xbf16>
    %18 = vector.shape_cast %17 : vector<32x8xbf16> to vector<4x8x8xbf16>
    %19 = vector.extract_strided_slice %8 {offsets = [0, 64], sizes = [32, 8], strides = [1, 1]} : vector<32x96xbf16> to vector<32x8xbf16>
    %20 = vector.shape_cast %19 : vector<32x8xbf16> to vector<4x8x8xbf16>
    "tpu.trace_start"() <{level = 10 : i32, message = "bqd,bkd->bqk"}> : () -> ()
    %cst_8 = arith.constant dense<0.000000e+00> : vector<4x8x8xf32>
    %21 = tpu.matmul %16, %18, %cst_8 {dimension_numbers = #tpu.dot_dimension_numbers<[2], [2], [1], [1], [0, 0, 0, 1, 1, 1], [0], [0]>} : vector<4x8x8xbf16>, vector<4x8x8xbf16>, vector<4x8x8xf32> -> vector<4x8x8xf32>
    "tpu.trace_stop"() : () -> ()
    %cst_9 = arith.constant 0.353553385 : f32
    %22 = vector.broadcast %cst_9 : f32 to vector<4x8x8xf32>
    %23 = arith.mulf %21, %22 : vector<4x8x8xf32>
    %24 = vector.shape_cast %14 : vector<8x8xf32> to vector<1x8x8xf32>
    %25 = vector.broadcast %24 : vector<1x8x8xf32> to vector<4x8x8xf32>
    %26 = arith.addf %23, %25 : vector<4x8x8xf32>
    %cst_10 = arith.constant dense<0xFF800000> : vector<4x8xf32>
    %27 = vector.multi_reduction <maximumf>, %26, %cst_10 [2] : vector<4x8x8xf32> to vector<4x8xf32>
    %28 = vector.shape_cast %27 : vector<4x8xf32> to vector<4x8x1xf32>
    %29 = vector.broadcast %28 : vector<4x8x1xf32> to vector<4x8x8xf32>
    %30 = arith.subf %26, %29 : vector<4x8x8xf32>
    %31 = math.exp %30 : vector<4x8x8xf32>
    %cst_11 = arith.constant dense<0.000000e+00> : vector<4x8xf32>
    %32 = vector.multi_reduction <add>, %31, %cst_11 [2] : vector<4x8x8xf32> to vector<4x8xf32>
    %33 = vector.shape_cast %32 : vector<4x8xf32> to vector<4x8x1xf32>
    %34 = tpu.reciprocal %33 {approx = true} : vector<4x8x1xf32> -> vector<4x8x1xf32>
    %35 = vector.broadcast %34 : vector<4x8x1xf32> to vector<4x8x8xf32>
    %36 = arith.mulf %31, %35 : vector<4x8x8xf32>
    %37 = arith.truncf %36 : vector<4x8x8xf32> to vector<4x8x8xbf16>
    "tpu.trace_start"() <{level = 10 : i32, message = "bqk,bkd->bqd"}> : () -> ()
    %cst_12 = arith.constant dense<0.000000e+00> : vector<4x8x8xf32>
    %38 = tpu.matmul %37, %20, %cst_12 {dimension_numbers = #tpu.dot_dimension_numbers<[2], [1], [1], [2], [0, 0, 0, 1, 1, 2], [0], [0]>} : vector<4x8x8xbf16>, vector<4x8x8xbf16>, vector<4x8x8xf32> -> vector<4x8x8xf32>
    "tpu.trace_stop"() : () -> ()
    %39 = vector.extract_strided_slice %8 {offsets = [0, 8], sizes = [32, 8], strides = [1, 1]} : vector<32x96xbf16> to vector<32x8xbf16>
    %40 = vector.shape_cast %39 : vector<32x8xbf16> to vector<4x8x8xbf16>
    %41 = vector.extract_strided_slice %8 {offsets = [0, 40], sizes = [32, 8], strides = [1, 1]} : vector<32x96xbf16> to vector<32x8xbf16>
    %42 = vector.shape_cast %41 : vector<32x8xbf16> to vector<4x8x8xbf16>
    %43 = vector.extract_strided_slice %8 {offsets = [0, 72], sizes = [32, 8], strides = [1, 1]} : vector<32x96xbf16> to vector<32x8xbf16>
    %44 = vector.shape_cast %43 : vector<32x8xbf16> to vector<4x8x8xbf16>
    "tpu.trace_start"() <{level = 10 : i32, message = "bqd,bkd->bqk"}> : () -> ()
    %cst_13 = arith.constant dense<0.000000e+00> : vector<4x8x8xf32>
    %45 = tpu.matmul %40, %42, %cst_13 {dimension_numbers = #tpu.dot_dimension_numbers<[2], [2], [1], [1], [0, 0, 0, 1, 1, 1], [0], [0]>} : vector<4x8x8xbf16>, vector<4x8x8xbf16>, vector<4x8x8xf32> -> vector<4x8x8xf32>
    "tpu.trace_stop"() : () -> ()
    %cst_14 = arith.constant 0.353553385 : f32
    %46 = vector.broadcast %cst_14 : f32 to vector<4x8x8xf32>
    %47 = arith.mulf %45, %46 : vector<4x8x8xf32>
    %48 = vector.shape_cast %14 : vector<8x8xf32> to vector<1x8x8xf32>
    %49 = vector.broadcast %48 : vector<1x8x8xf32> to vector<4x8x8xf32>
    %50 = arith.addf %47, %49 : vector<4x8x8xf32>
    %cst_15 = arith.constant dense<0xFF800000> : vector<4x8xf32>
    %51 = vector.multi_reduction <maximumf>, %50, %cst_15 [2] : vector<4x8x8xf32> to vector<4x8xf32>
    %52 = vector.shape_cast %51 : vector<4x8xf32> to vector<4x8x1xf32>
    %53 = vector.broadcast %52 : vector<4x8x1xf32> to vector<4x8x8xf32>
    %54 = arith.subf %50, %53 : vector<4x8x8xf32>
    %55 = math.exp %54 : vector<4x8x8xf32>
    %cst_16 = arith.constant dense<0.000000e+00> : vector<4x8xf32>
    %56 = vector.multi_reduction <add>, %55, %cst_16 [2] : vector<4x8x8xf32> to vector<4x8xf32>
    %57 = vector.shape_cast %56 : vector<4x8xf32> to vector<4x8x1xf32>
    %58 = tpu.reciprocal %57 {approx = true} : vector<4x8x1xf32> -> vector<4x8x1xf32>
    %59 = vector.broadcast %58 : vector<4x8x1xf32> to vector<4x8x8xf32>
    %60 = arith.mulf %55, %59 : vector<4x8x8xf32>
    %61 = arith.truncf %60 : vector<4x8x8xf32> to vector<4x8x8xbf16>
    "tpu.trace_start"() <{level = 10 : i32, message = "bqk,bkd->bqd"}> : () -> ()
    %cst_17 = arith.constant dense<0.000000e+00> : vector<4x8x8xf32>
    %62 = tpu.matmul %61, %44, %cst_17 {dimension_numbers = #tpu.dot_dimension_numbers<[2], [1], [1], [2], [0, 0, 0, 1, 1, 2], [0], [0]>} : vector<4x8x8xbf16>, vector<4x8x8xbf16>, vector<4x8x8xf32> -> vector<4x8x8xf32>
    "tpu.trace_stop"() : () -> ()
    %63 = vector.extract_strided_slice %8 {offsets = [0, 16], sizes = [32, 8], strides = [1, 1]} : vector<32x96xbf16> to vector<32x8xbf16>
    %64 = vector.shape_cast %63 : vector<32x8xbf16> to vector<4x8x8xbf16>
    %65 = vector.extract_strided_slice %8 {offsets = [0, 48], sizes = [32, 8], strides = [1, 1]} : vector<32x96xbf16> to vector<32x8xbf16>
    %66 = vector.shape_cast %65 : vector<32x8xbf16> to vector<4x8x8xbf16>
    %67 = vector.extract_strided_slice %8 {offsets = [0, 80], sizes = [32, 8], strides = [1, 1]} : vector<32x96xbf16> to vector<32x8xbf16>
    %68 = vector.shape_cast %67 : vector<32x8xbf16> to vector<4x8x8xbf16>
    "tpu.trace_start"() <{level = 10 : i32, message = "bqd,bkd->bqk"}> : () -> ()
    %cst_18 = arith.constant dense<0.000000e+00> : vector<4x8x8xf32>
    %69 = tpu.matmul %64, %66, %cst_18 {dimension_numbers = #tpu.dot_dimension_numbers<[2], [2], [1], [1], [0, 0, 0, 1, 1, 1], [0], [0]>} : vector<4x8x8xbf16>, vector<4x8x8xbf16>, vector<4x8x8xf32> -> vector<4x8x8xf32>
    "tpu.trace_stop"() : () -> ()
    %cst_19 = arith.constant 0.353553385 : f32
    %70 = vector.broadcast %cst_19 : f32 to vector<4x8x8xf32>
    %71 = arith.mulf %69, %70 : vector<4x8x8xf32>
    %72 = vector.shape_cast %14 : vector<8x8xf32> to vector<1x8x8xf32>
    %73 = vector.broadcast %72 : vector<1x8x8xf32> to vector<4x8x8xf32>
    %74 = arith.addf %71, %73 : vector<4x8x8xf32>
    %cst_20 = arith.constant dense<0xFF800000> : vector<4x8xf32>
    %75 = vector.multi_reduction <maximumf>, %74, %cst_20 [2] : vector<4x8x8xf32> to vector<4x8xf32>
    %76 = vector.shape_cast %75 : vector<4x8xf32> to vector<4x8x1xf32>
    %77 = vector.broadcast %76 : vector<4x8x1xf32> to vector<4x8x8xf32>
    %78 = arith.subf %74, %77 : vector<4x8x8xf32>
    %79 = math.exp %78 : vector<4x8x8xf32>
    %cst_21 = arith.constant dense<0.000000e+00> : vector<4x8xf32>
    %80 = vector.multi_reduction <add>, %79, %cst_21 [2] : vector<4x8x8xf32> to vector<4x8xf32>
    %81 = vector.shape_cast %80 : vector<4x8xf32> to vector<4x8x1xf32>
    %82 = tpu.reciprocal %81 {approx = true} : vector<4x8x1xf32> -> vector<4x8x1xf32>
    %83 = vector.broadcast %82 : vector<4x8x1xf32> to vector<4x8x8xf32>
    %84 = arith.mulf %79, %83 : vector<4x8x8xf32>
    %85 = arith.truncf %84 : vector<4x8x8xf32> to vector<4x8x8xbf16>
    "tpu.trace_start"() <{level = 10 : i32, message = "bqk,bkd->bqd"}> : () -> ()
    %cst_22 = arith.constant dense<0.000000e+00> : vector<4x8x8xf32>
    %86 = tpu.matmul %85, %68, %cst_22 {dimension_numbers = #tpu.dot_dimension_numbers<[2], [1], [1], [2], [0, 0, 0, 1, 1, 2], [0], [0]>} : vector<4x8x8xbf16>, vector<4x8x8xbf16>, vector<4x8x8xf32> -> vector<4x8x8xf32>
    "tpu.trace_stop"() : () -> ()
    %87 = vector.extract_strided_slice %8 {offsets = [0, 24], sizes = [32, 8], strides = [1, 1]} : vector<32x96xbf16> to vector<32x8xbf16>
    %88 = vector.shape_cast %87 : vector<32x8xbf16> to vector<4x8x8xbf16>
    %89 = vector.extract_strided_slice %8 {offsets = [0, 56], sizes = [32, 8], strides = [1, 1]} : vector<32x96xbf16> to vector<32x8xbf16>
    %90 = vector.shape_cast %89 : vector<32x8xbf16> to vector<4x8x8xbf16>
    %91 = vector.extract_strided_slice %8 {offsets = [0, 88], sizes = [32, 8], strides = [1, 1]} : vector<32x96xbf16> to vector<32x8xbf16>
    %92 = vector.shape_cast %91 : vector<32x8xbf16> to vector<4x8x8xbf16>
    "tpu.trace_start"() <{level = 10 : i32, message = "bqd,bkd->bqk"}> : () -> ()
    %cst_23 = arith.constant dense<0.000000e+00> : vector<4x8x8xf32>
    %93 = tpu.matmul %88, %90, %cst_23 {dimension_numbers = #tpu.dot_dimension_numbers<[2], [2], [1], [1], [0, 0, 0, 1, 1, 1], [0], [0]>} : vector<4x8x8xbf16>, vector<4x8x8xbf16>, vector<4x8x8xf32> -> vector<4x8x8xf32>
    "tpu.trace_stop"() : () -> ()
    %cst_24 = arith.constant 0.353553385 : f32
    %94 = vector.broadcast %cst_24 : f32 to vector<4x8x8xf32>
    %95 = arith.mulf %93, %94 : vector<4x8x8xf32>
    %96 = vector.shape_cast %14 : vector<8x8xf32> to vector<1x8x8xf32>
    %97 = vector.broadcast %96 : vector<1x8x8xf32> to vector<4x8x8xf32>
    %98 = arith.addf %95, %97 : vector<4x8x8xf32>
    %cst_25 = arith.constant dense<0xFF800000> : vector<4x8xf32>
    %99 = vector.multi_reduction <maximumf>, %98, %cst_25 [2] : vector<4x8x8xf32> to vector<4x8xf32>
    %100 = vector.shape_cast %99 : vector<4x8xf32> to vector<4x8x1xf32>
    %101 = vector.broadcast %100 : vector<4x8x1xf32> to vector<4x8x8xf32>
    %102 = arith.subf %98, %101 : vector<4x8x8xf32>
    %103 = math.exp %102 : vector<4x8x8xf32>
    %cst_26 = arith.constant dense<0.000000e+00> : vector<4x8xf32>
    %104 = vector.multi_reduction <add>, %103, %cst_26 [2] : vector<4x8x8xf32> to vector<4x8xf32>
    %105 = vector.shape_cast %104 : vector<4x8xf32> to vector<4x8x1xf32>
    %106 = tpu.reciprocal %105 {approx = true} : vector<4x8x1xf32> -> vector<4x8x1xf32>
    %107 = vector.broadcast %106 : vector<4x8x1xf32> to vector<4x8x8xf32>
    %108 = arith.mulf %103, %107 : vector<4x8x8xf32>
    %109 = arith.truncf %108 : vector<4x8x8xf32> to vector<4x8x8xbf16>
    "tpu.trace_start"() <{level = 10 : i32, message = "bqk,bkd->bqd"}> : () -> ()
    %cst_27 = arith.constant dense<0.000000e+00> : vector<4x8x8xf32>
    %110 = tpu.matmul %109, %92, %cst_27 {dimension_numbers = #tpu.dot_dimension_numbers<[2], [1], [1], [2], [0, 0, 0, 1, 1, 2], [0], [0]>} : vector<4x8x8xbf16>, vector<4x8x8xbf16>, vector<4x8x8xf32> -> vector<4x8x8xf32>
    "tpu.trace_stop"() : () -> ()
    %111 = tpu.concatenate %38, %62, %86, %110 in 2 : vector<4x8x8xf32>, vector<4x8x8xf32>, vector<4x8x8xf32>, vector<4x8x8xf32> -> vector<4x8x32xf32>
    %112 = vector.shape_cast %111 : vector<4x8x32xf32> to vector<32x32xf32>
    %113 = arith.truncf %112 : vector<32x32xf32> to vector<32x32xbf16>
    %c0_28 = arith.constant 0 : index
    %c0_29 = arith.constant 0 : index
    %114 = vector.load %arg4[%c0_28, %c0_29] : memref<32x32xbf16, #tpu.memory_space<vmem>>, vector<32x32xbf16>
    %cst_30 = arith.constant dense<0.000000e+00> : vector<32x32xf32>
    %115 = tpu.matmul %113, %114, %cst_30 {dimension_numbers = #tpu.dot_dimension_numbers<[1], [0], [0], [1], [0, 0, 1, 1], [], []>} : vector<32x32xbf16>, vector<32x32xbf16>, vector<32x32xf32> -> vector<32x32xf32>
    %c0_31 = arith.constant 0 : index
    %c0_32 = arith.constant 0 : index
    %116 = vector.load %arg5[%c0_31, %c0_32] : memref<1x32xf32, #tpu.memory_space<vmem>>, vector<1x32xf32>
    %117 = vector.broadcast %116 : vector<1x32xf32> to vector<32x32xf32>
    %118 = arith.addf %115, %117 : vector<32x32xf32>
    %119 = vector.shape_cast %118 : vector<32x32xf32> to vector<4x8x32xf32>
    %c0_33 = arith.constant 0 : index
    %c0_34 = arith.constant 0 : index
    %c0_35 = arith.constant 0 : index
    %120 = vector.load %arg6[%c0_33, %c0_34, %c0_35] : memref<4x8x32xf32, #tpu.memory_space<vmem>>, vector<4x8x32xf32>
    tpu.vector_store %arg6[%c0_33, %c0_34, %c0_35], %119 {strides = array<i32>} : memref<4x8x32xf32, #tpu.memory_space<vmem>>, vector<4x8x32xf32>,
    return
  }
  func.func @transform_0(%arg0: i32) -> (i32, i32, i32) {
    %c0_i32 = arith.constant 0 : i32
    %c0_i32_0 = arith.constant 0 : i32
    %c0_i32_1 = arith.constant 0 : i32
    return %arg0, %c0_i32, %c0_i32_0 : i32, i32, i32
  }
  func.func @transform_1(%arg0: i32) -> (i32, i32) {
    %c0_i32 = arith.constant 0 : i32
    %c0_i32_0 = arith.constant 0 : i32
    %c0_i32_1 = arith.constant 0 : i32
    return %c0_i32, %c0_i32_0 : i32, i32
  }
  func.func @transform_2(%arg0: i32) -> (i32, i32) {
    %c0_i32 = arith.constant 0 : i32
    %c0_i32_0 = arith.constant 0 : i32
    %c0_i32_1 = arith.constant 0 : i32
    return %c0_i32, %c0_i32_0 : i32, i32
  }
  func.func @transform_3(%arg0: i32) -> (i32, i32) {
    %c0_i32 = arith.constant 0 : i32
    %c0_i32_0 = arith.constant 0 : i32
    %c0_i32_1 = arith.constant 0 : i32
    return %c0_i32, %c0_i32_0 : i32, i32
  }
  func.func @transform_4(%arg0: i32) -> (i32, i32) {
    %c0_i32 = arith.constant 0 : i32
    %c0_i32_0 = arith.constant 0 : i32
    %c0_i32_1 = arith.constant 0 : i32
    return %c0_i32, %c0_i32_0 : i32, i32
  }
  func.func @transform_5(%arg0: i32) -> (i32, i32, i32) {
    %c0_i32 = arith.constant 0 : i32
    %c0_i32_0 = arith.constant 0 : i32
    %c0_i32_1 = arith.constant 0 : i32
    return %arg0, %c0_i32, %c0_i32_0 : i32, i32, i32
  }
}

</mosaic_0001>

<bundles_post_ra>
// kernel: tpu_custom_call.1
= control target key start
LH: loop header
LB: loop body
LE: loop exit
PB: predicated region body
PF: predicated region fallthrough
CT: control target
= control target key end

     0   :  { %10 = vsyncpa [#allocation3], 0  ;;  %s3698_s0 = inlined_call_operand.hbm [shape: f32[8,8,32], index: 0, kind: input, shape index: {}]   ;;  %s3699_s1 = inlined_call_operand.hbm [shape: bf16[32,96], index: 1, kind: input, shape index: {}]   ;;  %s3700_s2 = inlined_call_operand.vmem [shape: f32[1,96], index: 2, kind: input, shape index: {}]   ;;  %s3701_s3 = inlined_call_operand.hbm [shape: bf16[32,32], index: 3, kind: input, shape index: {}]   ;;  %s3702_s4 = inlined_call_operand.vmem [shape: f32[1,32], index: 4, kind: input, shape index: {}]   ;;  %s3703_s5 = inlined_call_operand.hbm [shape: f32[8,8,32], index: 5, kind: output, shape index: {}]  }
   0x1   :  { %12 = vsyncpa [#allocation3 + $0x1], 0 }
   0x2   :  { %13 = vsyncpa [#allocation6], 0 }
   0x3   :  { %14 = vsyncpa [#allocation4], 0 }
   0x4   :  { %16 = vsyncpa [#allocation4 + $0x1], 0  ;;  %s3159_s18 = smov 0   ;;  %s3161_s19 = smov 0  }
   0x5   :  { %s3163_s20 = smov 0   ;;  %s3165_s21 = smov 0  }
   0x6 LB: > { %s3180_s22 = sadd.s32 4294967295, %s3101_s21   ;;  %s2416_s23 = sadd.s32 4294967294, %s3101_s21   ;;  %s3101_s21 = sphi %s3165_s21, %s3725_s21   ;;  %s3097_s20 = sphi %s3163_s20, %s3724_s20   ;;  %s3093_s19 = sphi %s3161_s19, %s3723_s19   ;;  %s3089_s18 = sphi %s3159_s18, %s3722_s18  }
   0x7   : > { %p42_p0 = scmp.ne.s32.totalorder %s3093_s19, %s3089_s18  ;;  %p3704_p1 = scmp.eq.s32.totalorder %s3180_s22, 0 }
   0x8   : > { %p156_p3 = scmp.eq.s32.totalorder %s2416_s23, 1  ;;  %p2417_p5 = scmp.ge.s32.totalorder %s3101_s21, 1 }
   0x9   : > { %p3189_p4 = por %p3704_p1, %p42_p0  ;;  %p163_p7 = scmp.lt.s32.totalorder %s3101_s21, 3 }
   0xa   : > { %p3194_p6 = por %p156_p3, %p42_p0  ;;  %s3103_s27 = smov [#allocation5]  }
   0xb   : > { %s3708_s24 = scalar_select %p3189_p4, 1, 0 }
   0xc   : > { %s3709_s25 = scalar_select %p3194_p6, 1, 0 }
   0xd   : > { %p3199_p8 = pnand %p2417_p5, %p163_p7  ;;  %s175_s28 = sshll.u32 %s3103_s27, 4  ;;  %s176_s28 = int_to_ptr.vmem [resolvable:$true] %s175_s28 }
   0xe   : > { %s3104_s30 = smov [#allocation7]   ;;  %s2964_s7 = scalar_lea.vmem %s176_s28, 256 }
   0xf   : > { %s3710_s26 = scalar_select %p3199_p8, 1, 0 }
  0x10   : > { %p2778_p9 = pneg %p3199_p8  ;;  %s191_s6 = sshll.u32 %s3104_s30, 4  ;;  %s192_s6 = int_to_ptr.vmem [resolvable:$true] %s191_s6 }
  0x11   : > { %p2965_p13 = scmp.ne.s32.totalorder %s176_s28, %s2964_s7  ;;  %p2972_p5 = scmp.lt.s32.totalorder %s176_s28, %s176_s28 }
  0x12   : > { %p3208_p11 = pnand %p2778_p9, %p3704_p1  ;;  %p2973_p7 = scmp.lt.s32.totalorder %s2964_s7, %s2964_s7 }
  0x14   : > { %p2955_p12 = pneg %p3208_p11  ;;  %p2974_p10 = por %p2973_p7, %p2972_p5 }
  0x16   : > { %p2967_p0 = pnand %p2965_p13, %p2955_p12 }
  0x18   : > { %p2968_p3 = pneg %p2967_p0 }
  0x1a   : > { %p2975_p9 = pnand %p2974_p10, %p2968_p3 }
  0x1c   : > { %2978 = shalt.err (!%p2975_p9)
}
  0x1d   : > { %s3105_s8 = smov 64   ;;  %s3106_s9 = smov 4  }
  0x1e   : > { %2781 = dma.hbm_to_vmem [thread:$0]  (!%p3208_p11), %s3699_s1, 256, %s176_s28, [#allocation6], %s3105_s8, %s3105_s8, %s3106_s9  }
  0x1f   : > { %s2990_s12 = scalar_lea.vmem %s192_s6, 256  ;;  %p2998_p2 = scmp.lt.s32.totalorder %s192_s6, %s192_s6 }
  0x20   : > { %p2991_p1 = scmp.ne.s32.totalorder %s192_s6, %s2990_s12  ;;  %p2999_p6 = scmp.lt.s32.totalorder %s2990_s12, %s2990_s12 }
  0x22   : > { %p2993_p13 = pnand %p2991_p1, %p2955_p12  ;;  %p3000_p5 = por %p2999_p6, %p2998_p2 }
  0x24   : > { %p2994_p0 = pneg %p2993_p13 }
  0x26   : > { %p3001_p10 = pnand %p3000_p5, %p2994_p0 }
  0x28   : > { %3004 = shalt.err (!%p3001_p10)
}
  0x29   : > { %2784 = dma.hbm_to_vmem [thread:$0]  (!%p3208_p11), %s3701_s3, 256, %s192_s6, [#allocation6], %s3105_s8, %s3105_s8, %s3106_s9  }
  0x2a   : > { %s3231_s15 = sadd.s32 1, %s3101_s21   ;;  %s29_s16 = sadd.s32 1, %s3097_s20 }
  0x2b   : > { %s26_s17 = ssub.s32 %s3101_s21, %s3231_s15  ;;  %p36_p1 = scmp.ne.s32.totalorder %s3097_s20, %s3093_s19 }
  0x2c   : > { %p27_p2 = scmp.eq.s32.totalorder %s26_s17, 0  ;;  %p37_p6 = scmp.eq.s32.totalorder %s3101_s21, 0 }
  0x2d   : > { %p3712_p12 = scmp.eq.s32.totalorder %s3180_s22, 1  ;;  %p2795_p7 = scmp.lt.s32.totalorder %s3101_s21, 2 }
  0x2e   : > { %s3247_s27 = scalar_select %p27_p2, %s3097_s20, %s29_s16  }
  0x2f   : > { %p3241_p3 = por %p3712_p12, %p36_p1  ;;  %p38_p9 = por %p37_p6, %p36_p1 }
  0x30   : > { %s208_s28 = sand.u32 1, %s3097_s20   ;;  %s2480_s30 = sshll.u32 %s3101_s21, 9 }
  0x31   : > { %s3713_s23 = scalar_select %p3241_p3, 1, 0 }
  0x32   : > { %s2421_s29 = sshll.u32 %s208_s28, 5  ;;  %s3254_s8 = scalar_lea.hbm %s3698_s0, %s2480_s30 }
  0x33   : > { %s212_s9 = scalar_lea.vmem [#allocation2], %s2421_s29  ;;  %p3258_p11 = pnand %p2795_p7, %p38_p9 }
  0x34   : > { %s219_s10 = sshll.u32 %s212_s9, 4  ;;  %s3262_s12 = scalar_lea.sflag [#allocation3], %s208_s28  ;;  %s3256_s10 = int_to_ptr.vmem [resolvable:$true] %s219_s10 }
  0x35   : > { %s3005_s13 = scalar_lea.hbm %s3254_s8, 512  ;;  %p3007_p0 = pneg %p3258_p11 }
  0x36   : > { %p3006_p13 = scmp.ne.s32.totalorder %s3254_s8, %s3005_s13  ;;  %s3010_s17 = scalar_lea.hbm %s3698_s0, 1024 }
  0x37   : > { %p3011_p1 = scmp.lt.s32.totalorder %s3254_s8, %s3698_s0  ;;  %p3012_p2 = scmp.lt.s32.totalorder %s3010_s17, %s3005_s13 }
  0x38   : > { %p3008_p5 = pnand %p3007_p0, %p3006_p13 }
  0x39   : > { %p3013_p6 = por %p3012_p2, %p3011_p1 }
  0x3a   : > { %p3009_p10 = pneg %p3008_p5 }
  0x3c   : > { %p3014_p12 = pnand %p3013_p6, %p3009_p10 }
  0x3e   : > { %3017 = shalt.err (!%p3014_p12)
}
  0x3f   : > { %s3018_s28 = scalar_lea.vmem %s3256_s10, 512  ;;  %s3107_s6 = smov [#allocation2]  }
  0x40   : > { %p3019_p7 = scmp.ne.s32.totalorder %s3256_s10, %s3018_s28  ;;  %s3023_s7 = sshll.u32 %s3107_s6, 4  ;;  %s3024_s7 = int_to_ptr.vmem [resolvable:$false] %s3023_s7 }
  0x41   : > { %s3025_s9 = scalar_lea.vmem %s3024_s7, 1024  ;;  %p3026_p5 = scmp.lt.s32.totalorder %s3256_s10, %s3024_s7 }
  0x42   : > { %p3021_p9 = pnand %p3019_p7, %p3007_p0  ;;  %p3027_p3 = scmp.lt.s32.totalorder %s3025_s9, %s3018_s28 }
  0x44   : > { %p3022_p13 = pneg %p3021_p9  ;;  %p3028_p4 = por %p3027_p3, %p3026_p5 }
  0x46   : > { %p3029_p8 = pnand %p3028_p4, %p3022_p13 }
  0x48   : > { %3032 = shalt.err (!%p3029_p8)
}
  0x49   : > { %s3108_s13 = smov 128   ;;  %s3109_s14 = smov 8  }
  0x4a   : > { %2788 = dma.hbm_to_vmem [thread:$0]  (!%p3258_p11), %s3254_s8, 512, %s3256_s10, %s3262_s12, %s3108_s13, %s3108_s13, %s3109_s14  }
  0x4b   : > { %p3715_p0 = scmp.ne.s32.totalorder %s3710_s26, 0 }
  0x4c   : > { %s3286_s16 = sand.u32 (!%p3715_p0), 1, %s3093_s19   ;;  %p3716_p4 = scmp.ne.s32.totalorder (!%p3715_p0), %s3708_s24, 0 }
  0x4d   : > { %231 = sbr.rel (%p3715_p0) target bundleno = 3198 (0xc7e), region = 40  ;;  %s2425_s17 = sshll.u32 (!%p3715_p0), %s3286_s16, 5 }
  0x4e   : > { %s234_s29 = scalar_lea.sflag (!%p3715_p0), [#allocation3], %s3286_s16  ;;  %s237_s30 = scalar_lea.vmem (!%p3715_p0), [#allocation2], %s2425_s17 }
  0x52   : > { %3076 = dma.done.wait (%p3716_p4), %s234_s29, 512  }
  0x53   : > { %3078 = vsyncadd (%p3716_p4), %s234_s29, 4294966784  ;;  %p3717_p8 = scmp.eq.s32.totalorder %s3180_s22, 0 }
  0x55   : > { %3080 = dma.done.wait (%p3717_p8), [#allocation6], 512   ;;  %p3718_p3 = pmov %p3717_p8 }
  0x56   : > { %v2885_v0 = vld [vmem:[#allocation5 + $0x8] sm:$0xff]   ;;  %v2886_v1 = vld [vmem:[#allocation5] sm:$0xff]   ;;  %vm304_vm0 = vcmask 261120   ;;  %v277_v4 = vld [vmem:[%s237_s30 + $0x10] sm:$0xff]  ;;  %v3110_v8 = vmov 0.0   ;;  %vm3111_vm1 = vmmov 0   ;;  %v362_v30 = vlaneseq }
  0x57   : > { %3082 = vsyncadd (%p3718_p3), [#allocation6], 4294966784  ;;  %2558 = vmatprep.subr.bf16.mxu0 %v2885_v0  ;;  %v275_v2 = vld [vmem:[%s237_s30] sm:$0xff]  ;;  %v276_v3 = vld [vmem:[%s237_s30 + $0x8] sm:$0xff]  ;;  %2566 = vmatprep.subr.bf16.mxu1 %v3110_v8  ;;  %s3112_s8 = smov 96   ;;  %vm380_vm2 = vcmask 64512  }
  0x58   : > { %2559 = vmatpush3.bf16.msra.mxu0 %v2885_v0  ;;  %v279_v5 = vpack.c.bf16 %v276_v3, %v275_v2  ;;  %v278_v6 = vld [vmem:[%s237_s30 + $0x18] sm:$0xff]  ;;  %v2429_v9 = vld [vmem:[%s3700_s2] ss:$0 sm:$0xff]  ;;  %2568 = vmatprep.mubr.msk.bf16.mxu1 %vm3111_vm1, %v3110_v8  ;;  %v363_v31 = vshrl.u32 %v362_v30, 7  ;;  %v365_v32 = vand.u32 127, %v362_v30  ;;  %s3114_s10 = smov 64  }
  0x59   : > { %2560 = vmatprep.subr.bf16.mxu0 %v2886_v1  ;;  %v280_v7 = vpack.c.bf16 %v278_v6, %v277_v4  ;;  %v3113_v34 = vmov -1e+30   ;;  %vm632_vm4 = vcmask 1043456   ;;  %s3115_s11 = smov 88   ;;  %s3116_s12 = smov 120   ;;  %vm2216_vm5 = vcmask 130048  }
  0x5a   : > { %2562 = vmatprep.mubr.msk.bf16.mxu0 %vm304_vm0, %v279_v5  ;;  %vm366_vm3 = vcmp.le.s32.totalorder %v365_v32, %v363_v31  ;;  %s3117_s28 = smov 56   ;;  %s3118_s6 = smov 80   ;;  %vm2221_vm6 = vcmask 195584  }
  0x5b   : > { %v3347_v35 = vsel %vm366_vm3, 0.0, %v3113_v34  ;;  %s3119_s7 = smov 112   ;;  %s3120_s9 = smov 48  }
  0x5c   : > { %2561 = vmatpush3.bf16.msra.mxu0 %v2886_v1  ;;  %s3121_s13 = smov 72   ;;  %s3122_s14 = smov 104  }
  0x5d   : > { %2572 = vmatprep.subr.bf16.mxu0 %v3110_v8  ;;  %s3123_s29 = smov 40   ;;  %s3124_s30 = smov 8  }
  0x5e   : > { %s3125_s24 = smov 16   ;;  %s3126_s26 = smov 24  }
  0x5f   : > { %2563 = vmatmul.mubr.msk.bf16.vlgmr.msra.gmra.mxu0 %vm304_vm0, %v280_v7  ;;  %p3719_p10 = scmp.ne.s32.totalorder %s3713_s23, 0 }
  0x60   : > { %2574 = vmatprep.mubr.msk.bf16.mxu0 %vm3111_vm1, %v3110_v8 }
 0x11f   : > { %v2564_v10 = vpop.f32.mrf.mxu0 }
 0x120   : > { %v354_v11 = vadd.f32 %v2564_v10, %v2429_v9 }
 0x121   : > { %v345_v12 = vpop.f32.mrf.mxu0 }
 0x122   : > { %v3311_v13 = vpack.c.bf16 %v354_v11, %v354_v11  ;;  %v346_v14 = vadd.f32 %v2429_v9, %v345_v12 }
 0x123   : > { %v2565_v15 = vpop.f32.mrf.mxu0 }
 0x124   : > { %v3313_v16 = vpack.c.bf16 %v346_v14, %v346_v14  ;;  %v357_v17 = vadd.f32 %v2565_v15, %v2429_v9  ;;  %475 = vrot.lane.b32.xlu1 %v3311_v13, %s3112_s8 }
 0x125   : > { %v348_v18 = vpop.f32.mrf.mxu0 }
 0x126   : > { %v3316_v19 = vpack.c.bf16 %v357_v17, %v357_v17  ;;  %v349_v20 = vadd.f32 %v2429_v9, %v348_v18  ;;  %378 = vrot.lane.b32.xlu0 %v3313_v16, %s3112_s8 }
 0x128   : > { %v3319_v21 = vpack.c.bf16 %v349_v20, %v349_v20  ;;  %523 = vrot.lane.b32.xlu1 %v3316_v19, %s3112_s8 }
 0x12a   : > { %427 = vrot.lane.b32.xlu0 %v3319_v21, %s3112_s8 }
 0x196   : > { %v476_v24 = vpop.permute.xlu1 %475 }
 0x197   : > { %v481_v27 = vsel %vm380_vm2, %v476_v24, 0 }
 0x198   : > { %v379_v22 = vpop.permute.xlu0 %378 }
 0x199   : > { %v385_v23 = vsel %vm380_vm2, %v379_v22, 0 }
 0x19a   : > { %2567 = vmatpush3.bf16.xpose.msra.mxu1 %v385_v23  ;;  %v524_v28 = vpop.permute.xlu1 %523 }
 0x19b   : > { %2578 = vmatprep.subr.bf16.mxu1 %v3110_v8  ;;  %v529_v29 = vsel %vm380_vm2, %v524_v28, 0 }
 0x19c   : > { %v428_v25 = vpop.permute.xlu0 %427 }
 0x19d   : > { %v433_v26 = vsel %vm380_vm2, %v428_v25, 0 }
 0x19e   : > { %2573 = vmatpush3.bf16.xpose.msra.mxu0 %v433_v26 }
 0x19f   : > { %2584 = vmatprep.subr.bf16.mxu0 %v3110_v8 }
 0x1a1   : > { %2569 = vmatmul.mubr.msk.bf16.vlgmr.msra.gmra.mxu1 %vm380_vm2, %v3313_v16 }
 0x1a2   : > { %2579 = vmatpush3.bf16.xpose.msra.mxu1 %v481_v27  ;;  %2580 = vmatprep.mubr.msk.bf16.mxu1 %vm3111_vm1, %v3110_v8 }
 0x1a3   : > { %2590 = vmatprep.subr.bf16.mxu1 %v3110_v8 }
 0x1a5   : > { %2575 = vmatmul.mubr.msk.bf16.vlgmr.msra.gmra.mxu0 %vm380_vm2, %v3319_v21 }
 0x1a6   : > { %2585 = vmatpush3.bf16.xpose.msra.mxu0 %v529_v29  ;;  %2586 = vmatprep.mubr.msk.bf16.mxu0 %vm3111_vm1, %v3110_v8 }
 0x1a7   : > { %2596 = vmatprep.subr.bf16.mxu0 %v3110_v8 }
 0x1a9   : > { %2581 = vmatmul.mubr.msk.bf16.vlgmr.msra.gmra.mxu1 %vm380_vm2, %v3311_v13 }
 0x1aa   : > { %2592 = vmatprep.mubr.msk.bf16.mxu1 %vm3111_vm1, %v3110_v8 }
 0x1ad   : > { %2587 = vmatmul.mubr.msk.bf16.vlgmr.msra.gmra.mxu0 %vm380_vm2, %v3316_v19 }
 0x1ae   : > { %2598 = vmatprep.mubr.msk.bf16.mxu0 %vm3111_vm1, %v3110_v8 }
 0x261   : > { %v421_v33 = vpop.f32.mrf.mxu1 }
 0x262   : > { %v571_v36 = vmul.f32 0.35355338, %v421_v33 }
 0x263   : > { %v2570_v37 = vpop.f32.mrf.mxu1 }
 0x264   : > { %v575_v38 = vadd.f32 %v571_v36, %v3347_v35 }
 0x265   : > { %v424_v39 = vpop.f32.mrf.mxu1  ;;  %v469_v40 = vpop.f32.mrf.mxu0 }
 0x266   : > { %v572_v41 = vmul.f32 0.35355338, %v469_v40  ;;  %v579_v42 = vsel %vm380_vm2, %v575_v38, -inf }
 0x267   : > { %580 = vmax.xlane.f32.xlu0 %v579_v42  ;;  %v2571_v43 = vpop.f32.mrf.mxu1  ;;  %v2576_v44 = vpop.f32.mrf.mxu0 }
 0x268   : > { %v576_v45 = vadd.f32 %v572_v41, %v3347_v35 }
 0x269   : > { %v472_v46 = vpop.f32.mrf.mxu0  ;;  %v517_v47 = vpop.f32.mrf.mxu1 }
 0x26a   : > { %v573_v48 = vmul.f32 0.35355338, %v517_v47  ;;  %v582_v49 = vsel %vm380_vm2, %v576_v45, -inf }
 0x26b   : > { %v2582_v50 = vpop.f32.mrf.mxu1  ;;  %583 = vmax.xlane.f32.xlu1 %v582_v49  ;;  %v2577_v51 = vpop.f32.mrf.mxu0 }
 0x26c   : > { %v577_v52 = vadd.f32 %v573_v48, %v3347_v35 }
 0x26d   : > { %v520_v53 = vpop.f32.mrf.mxu1  ;;  %v565_v54 = vpop.f32.mrf.mxu0 }
 0x26e   : > { %v574_v55 = vmul.f32 0.35355338, %v565_v54  ;;  %v585_v56 = vsel %vm380_vm2, %v577_v52, -inf }
 0x26f   : > { %586 = vmax.xlane.f32.xlu0 %v585_v56  ;;  %v2583_v57 = vpop.f32.mrf.mxu1  ;;  %v2588_v58 = vpop.f32.mrf.mxu0 }
 0x270   : > { %v578_v59 = vadd.f32 %v574_v55, %v3347_v35 }
 0x271   : > { %v568_v60 = vpop.f32.mrf.mxu0 }
 0x272   : > { %v588_v61 = vsel %vm380_vm2, %v578_v59, -inf }
 0x273   : > { %589 = vmax.xlane.f32.xlu0 %v588_v61  ;;  %v2589_v62 = vpop.f32.mrf.mxu0 }
 0x27c   : > { %627 = vrot.lane.b32.xlu1 %v3313_v16, %s3114_s10 }
 0x2f0   : > { %v581_v63 = vpop.xlane.xlu0 %580 }
 0x2f1   : > { %v591_v0 = vsub.f32 %v575_v38, %v581_v63 }
 0x2f3   : > { %v595_v1 = vmul.f32 1.442695, %v591_v0 }
 0x2f4   : > { %v584_v2 = vpop.xlane.xlu1 %583 }
 0x2f5   : > { %2889 = vpow2.f32 %v595_v1  ;;  %v592_v3 = vsub.f32 %v576_v45, %v584_v2 }
 0x2f7   : > { %v597_v4 = vmul.f32 1.442695, %v592_v3 }
 0x2f8   : > { %v628_v5 = vpop.permute.xlu1 %627  ;;  %v587_v12 = vpop.xlane.xlu0 %586 }
 0x2f9   : > { %2891 = vpow2.f32 %v597_v4  ;;  %v634_v6 = vsel %vm632_vm4, %v628_v5, 0  ;;  %v593_v15 = vsub.f32 %v577_v52, %v587_v12 }
 0x2fa   : > { %2591 = vmatpush3.bf16.msra.mxu1 %v634_v6 }
 0x2fb   : > { %2602 = vmatprep.subr.bf16.mxu1 %v3110_v8  ;;  %v599_v18 = vmul.f32 1.442695, %v593_v15 }
 0x2fc   : > { %v590_v14 = vpop.xlane.xlu0 %589 }
 0x2fd   : > { %v594_v17 = vsub.f32 %v578_v59, %v590_v14  ;;  %2893 = vpow2.f32 %v599_v18 }
 0x2ff   : > { %v601_v20 = vmul.f32 1.442695, %v594_v17 }
 0x301   : > { %2895 = vpow2.f32 %v601_v20 }
 0x302   : > { %v2890_v7 = vpop.eup %2889 }
 0x303   : > { %v603_v9 = vsel %vm380_vm2, %v2890_v7, 0.0 }
 0x304   : > { %604 = vadd.xlane.f32.xlu1 %v603_v9 }
 0x306   : > { %v2892_v10 = vpop.eup %2891 }
 0x307   : > { %v606_v11 = vsel %vm380_vm2, %v2892_v10, 0.0 }
 0x308   : > { %607 = vadd.xlane.f32.xlu0 %v606_v11 }
 0x30a   : > { %v2894_v22 = vpop.eup %2893 }
 0x30b   : > { %v609_v24 = vsel %vm380_vm2, %v2894_v22, 0.0 }
 0x30e   : > { %v2896_v23 = vpop.eup %2895 }
 0x30f   : > { %v612_v25 = vsel %vm380_vm2, %v2896_v23, 0.0 }
 0x315   : > { %724 = vrot.lane.b32.xlu1 %v3311_v13, %s3114_s10 }
 0x319   : > { %772 = vrot.lane.b32.xlu1 %v3316_v19, %s3114_s10 }
 0x31e   : > { %676 = vrot.lane.b32.xlu0 %v3319_v21, %s3114_s10 }
 0x33d   : > { %610 = vadd.xlane.f32.xlu1 %v609_v24  ;;  %613 = vadd.xlane.f32.xlu0 %v612_v25 }
 0x34e   : > { %872 = vrot.lane.b32.xlu1 %v3319_v21, %s3115_s11 }
 0x352   : > { %870 = vrot.lane.b32.xlu1 %v3319_v21, %s3116_s12 }
 0x353   : > { %822 = vrot.lane.b32.xlu0 %v3313_v16, %s3115_s11 }
 0x356   : > { %972 = vrot.lane.b32.xlu1 %v3316_v19, %s3115_s11 }
 0x357   : > { %820 = vrot.lane.b32.xlu0 %v3313_v16, %s3116_s12 }
 0x35a   : > { %970 = vrot.lane.b32.xlu1 %v3316_v19, %s3116_s12 }
 0x35b   : > { %922 = vrot.lane.b32.xlu0 %v3311_v13, %s3115_s11  ;;  %s271_s11 = scalar_lea.vmem [#allocation8], %s2425_s17 }
 0x35f   : > { %920 = vrot.lane.b32.xlu0 %v3311_v13, %s3116_s12  ;;  %s2324_s12 = sshll.u32 %s271_s11, 4  ;;  %s3647_s12 = int_to_ptr.vmem [resolvable:$true] %s2324_s12 }
 0x38d   : > { %v605_v26 = vpop.xlane.xlu1 %604 }
 0x38e   : > { %2897 = vrcp.f32 %v605_v26 }
 0x391   : > { %v608_v27 = vpop.xlane.xlu0 %607  ;;  %v725_v31 = vpop.permute.xlu1 %724 }
 0x392   : > { %2899 = vrcp.f32 %v608_v27  ;;  %v730_v36 = vsel %vm632_vm4, %v725_v31, 0 }
 0x395   : > { %v677_v28 = vpop.permute.xlu0 %676  ;;  %v773_v38 = vpop.permute.xlu1 %772 }
 0x396   : > { %v682_v29 = vsel %vm632_vm4, %v677_v28, 0  ;;  %v778_v40 = vsel %vm632_vm4, %v773_v38, 0 }
 0x397   : > { %2597 = vmatpush3.bf16.msra.mxu0 %v682_v29 }
 0x398   : > { %2608 = vmatprep.subr.bf16.mxu0 %v3110_v8 }
 0x39b   : > { %v2898_v30 = vpop.eup %2897 }
 0x39c   : > { %v619_v32 = vmul.f32 %v2898_v30, %v2890_v7 }
 0x39e   : > { %v623_v33 = vpack.c.bf16 %v619_v32, %v619_v32 }
 0x39f   : > { %v2900_v34 = vpop.eup %2899 }
 0x3a0   : > { %2593 = vmatmul.mubr.msk.bf16.vlgmr.msra.gmra.mxu1 %vm380_vm2, %v623_v33  ;;  %v620_v37 = vmul.f32 %v2900_v34, %v2892_v10 }
 0x3a1   : > { %2603 = vmatpush3.bf16.msra.mxu1 %v730_v36  ;;  %2604 = vmatprep.mubr.msk.bf16.mxu1 %vm3111_vm1, %v3110_v8 }
 0x3a2   : > { %v624_v39 = vpack.c.bf16 %v620_v37, %v620_v37  ;;  %2614 = vmatprep.subr.bf16.mxu1 %v3110_v8 }
 0x3a4   : > { %2599 = vmatmul.mubr.msk.bf16.vlgmr.msra.gmra.mxu0 %vm380_vm2, %v624_v39 }
 0x3a5   : > { %2609 = vmatpush3.bf16.msra.mxu0 %v778_v40  ;;  %2610 = vmatprep.mubr.msk.bf16.mxu0 %vm3111_vm1, %v3110_v8 }
 0x3a6   : > { %2620 = vmatprep.subr.bf16.mxu0 %v3110_v8 }
 0x3c6   : > { %v611_v41 = vpop.xlane.xlu1 %610  ;;  %v614_v42 = vpop.xlane.xlu0 %613 }
 0x3c7   : > { %2901 = vrcp.f32 %v611_v41 }
 0x3c8   : > { %2903 = vrcp.f32 %v614_v42 }
 0x3ca   : > { %v823_v43 = vpop.permute.xlu0 %822  ;;  %v873_v44 = vpop.permute.xlu1 %872 }
 0x3cb   : > { %v828_v52 = vsel %vm380_vm2, %v823_v43, 0  ;;  %v878_v54 = vsel %vm380_vm2, %v873_v44, 0 }
 0x3ce   : > { %v821_v50 = vpop.permute.xlu0 %820  ;;  %v871_v53 = vpop.permute.xlu1 %870 }
 0x3d2   : > { %v923_v55 = vpop.permute.xlu0 %922  ;;  %v973_v56 = vpop.permute.xlu1 %972 }
 0x3d3   : > { %v928_v57 = vsel %vm380_vm2, %v923_v55, 0  ;;  %v978_v58 = vsel %vm380_vm2, %v973_v56, 0 }
 0x3d4   : > { %v2902_v45 = vpop.eup %2901 }
 0x3d5   : > { %v2904_v46 = vpop.eup %2903  ;;  %v621_v47 = vmul.f32 %v2902_v45, %v2894_v22 }
 0x3d6   : > { %v622_v48 = vmul.f32 %v2904_v46, %v2896_v23  ;;  %v921_v59 = vpop.permute.xlu0 %920  ;;  %v971_v60 = vpop.permute.xlu1 %970 }
 0x3d7   : > { %v625_v49 = vpack.c.bf16 %v621_v47, %v621_v47 }
 0x3d8   : > { %v626_v51 = vpack.c.bf16 %v622_v48, %v622_v48 }
 0x3d9   : > { %2605 = vmatmul.mubr.msk.bf16.vlgmr.msra.gmra.mxu1 %vm380_vm2, %v625_v49 }
 0x3da   : > { %2611 = vmatmul.mubr.msk.bf16.vlgmr.msra.gmra.mxu0 %vm380_vm2, %v626_v51  ;;  %2615 = vmatpush3.bf16.xpose.msra.mxu1 %v828_v52 }
 0x3db   : > { %2621 = vmatpush3.bf16.xpose.msra.mxu0 %v878_v54  ;;  %2616 = vmatprep.mubr.msk.bf16.mxu1 %vm3111_vm1, %v3110_v8 }
 0x3dc   : > { %2622 = vmatprep.mubr.msk.bf16.mxu0 %vm3111_vm1, %v3110_v8  ;;  %2626 = vmatprep.subr.bf16.mxu1 %v3110_v8 }
 0x3dd   : > { %2632 = vmatprep.subr.bf16.mxu0 %v3110_v8 }
 0x3e1   : > { %2617 = vmatmul.mubr.msk.bf16.vlgmr.msra.gmra.mxu1 %vm380_vm2, %v821_v50 }
 0x3e2   : > { %2623 = vmatmul.mubr.msk.bf16.vlgmr.msra.gmra.mxu0 %vm380_vm2, %v871_v53  ;;  %2627 = vmatpush3.bf16.xpose.msra.mxu1 %v928_v57 }
 0x3e3   : > { %2633 = vmatpush3.bf16.xpose.msra.mxu0 %v978_v58  ;;  %2628 = vmatprep.mubr.msk.bf16.mxu1 %vm3111_vm1, %v3110_v8 }
 0x3e4   : > { %2634 = vmatprep.mubr.msk.bf16.mxu0 %vm3111_vm1, %v3110_v8  ;;  %2638 = vmatprep.subr.bf16.mxu1 %v3110_v8 }
 0x3e5   : > { %2644 = vmatprep.subr.bf16.mxu0 %v3110_v8 }
 0x3e9   : > { %2629 = vmatmul.mubr.msk.bf16.vlgmr.msra.gmra.mxu1 %vm380_vm2, %v921_v59 }
 0x3ea   : > { %2635 = vmatmul.mubr.msk.bf16.vlgmr.msra.gmra.mxu0 %vm380_vm2, %v971_v60  ;;  %2640 = vmatprep.mubr.msk.bf16.mxu1 %vm3111_vm1, %v3110_v8 }
 0x3eb   : > { %2646 = vmatprep.mubr.msk.bf16.mxu0 %vm3111_vm1, %v3110_v8 }
 0x460   : > { %v3413_v61 = vpop.f32.mrf.mxu1 }
 0x462   : > { %v2594_v62 = vpop.f32.mrf.mxu1 }
 0x464   : > { %v673_v63 = vpop.f32.mrf.mxu1  ;;  %v3415_v0 = vpop.f32.mrf.mxu0 }
 0x466   : > { %v2595_v1 = vpop.f32.mrf.mxu1  ;;  %v2600_v2 = vpop.f32.mrf.mxu0 }
 0x468   : > { %v721_v3 = vpop.f32.mrf.mxu0 }
 0x46a   : > { %v2601_v4 = vpop.f32.mrf.mxu0 }
 0x499   : > { %v3417_v5 = vpop.f32.mrf.mxu1 }
 0x49a   : > { %v3419_v6 = vpop.f32.mrf.mxu0 }
 0x49b   : > { %v2606_v7 = vpop.f32.mrf.mxu1 }
 0x49c   : > { %v2612_v9 = vpop.f32.mrf.mxu0 }
 0x49d   : > { %v769_v10 = vpop.f32.mrf.mxu1 }
 0x49e   : > { %v817_v11 = vpop.f32.mrf.mxu0 }
 0x49f   : > { %v2607_v12 = vpop.f32.mrf.mxu1 }
 0x4a0   : > { %v2613_v14 = vpop.f32.mrf.mxu0 }
 0x4a1   : > { %v864_v15 = vpop.f32.mrf.mxu1 }
 0x4a2   : > { %v1020_v17 = vmul.f32 0.35355338, %v864_v15  ;;  %v914_v18 = vpop.f32.mrf.mxu0 }
 0x4a3   : > { %v1021_v20 = vmul.f32 0.35355338, %v914_v18  ;;  %v2618_v22 = vpop.f32.mrf.mxu1 }
 0x4a4   : > { %v2624_v23 = vpop.f32.mrf.mxu0  ;;  %v1024_v24 = vadd.f32 %v1020_v17, %v3347_v35 }
 0x4a5   : > { %v867_v25 = vpop.f32.mrf.mxu1  ;;  %v1025_v26 = vadd.f32 %v1021_v20, %v3347_v35 }
 0x4a6   : > { %v917_v27 = vpop.f32.mrf.mxu0  ;;  %v1028_v28 = vsel %vm380_vm2, %v1024_v24, -inf }
 0x4a7   : > { %v1031_v29 = vsel %vm380_vm2, %v1025_v26, -inf  ;;  %1029 = vmax.xlane.f32.xlu0 %v1028_v28  ;;  %v2619_v30 = vpop.f32.mrf.mxu1 }
 0x4a8   : > { %1032 = vmax.xlane.f32.xlu1 %v1031_v29  ;;  %v2625_v31 = vpop.f32.mrf.mxu0 }
 0x4a9   : > { %v964_v32 = vpop.f32.mrf.mxu1 }
 0x4aa   : > { %v1022_v33 = vmul.f32 0.35355338, %v964_v32  ;;  %v1014_v34 = vpop.f32.mrf.mxu0 }
 0x4ab   : > { %v1023_v36 = vmul.f32 0.35355338, %v1014_v34  ;;  %v2630_v37 = vpop.f32.mrf.mxu1 }
 0x4ac   : > { %v2636_v38 = vpop.f32.mrf.mxu0  ;;  %v1026_v39 = vadd.f32 %v1022_v33, %v3347_v35 }
 0x4ad   : > { %v967_v40 = vpop.f32.mrf.mxu1  ;;  %v1027_v43 = vadd.f32 %v1023_v36, %v3347_v35 }
 0x4ae   : > { %v1017_v41 = vpop.f32.mrf.mxu0  ;;  %v1034_v42 = vsel %vm380_vm2, %v1026_v39, -inf }
 0x4af   : > { %1035 = vmax.xlane.f32.xlu0 %v1034_v42  ;;  %v2631_v44 = vpop.f32.mrf.mxu1  ;;  %v1037_v46 = vsel %vm380_vm2, %v1027_v43, -inf }
 0x4b0   : > { %v2637_v45 = vpop.f32.mrf.mxu0 }
 0x4b3   : > { %1038 = vmax.xlane.f32.xlu0 %v1037_v46 }
 0x4b9   : > { %1076 = vrot.lane.b32.xlu1 %v3313_v16, %s3117_s28 }
 0x530   : > { %v1030_v47 = vpop.xlane.xlu0 %1029 }
 0x531   : > { %v1033_v48 = vpop.xlane.xlu1 %1032  ;;  %v1040_v49 = vsub.f32 %v1024_v24, %v1030_v47 }
 0x532   : > { %v1041_v50 = vsub.f32 %v1025_v26, %v1033_v48 }
 0x533   : > { %v1044_v51 = vmul.f32 1.442695, %v1040_v49 }
 0x534   : > { %v1046_v52 = vmul.f32 1.442695, %v1041_v50 }
 0x535   : > { %2905 = vpow2.f32 %v1044_v51  ;;  %v1077_v53 = vpop.permute.xlu1 %1076 }
 0x536   : > { %2907 = vpow2.f32 %v1046_v52  ;;  %v1082_v54 = vsel %vm632_vm4, %v1077_v53, 0 }
 0x537   : > { %2639 = vmatpush3.bf16.msra.mxu1 %v1082_v54 }
 0x538   : > { %2650 = vmatprep.subr.bf16.mxu1 %v3110_v8  ;;  %v1036_v59 = vpop.xlane.xlu0 %1035 }
 0x539   : > { %v1042_v63 = vsub.f32 %v1026_v39, %v1036_v59 }
 0x53b   : > { %v1048_v2 = vmul.f32 1.442695, %v1042_v63 }
 0x53c   : > { %v1039_v60 = vpop.xlane.xlu0 %1038 }
 0x53d   : > { %v1043_v62 = vsub.f32 %v1027_v43, %v1039_v60 }
 0x53f   : > { %v1050_v1 = vmul.f32 1.442695, %v1043_v62 }
 0x541   : > { %2909 = vpow2.f32 %v1050_v1 }
 0x542   : > { %v2906_v55 = vpop.eup %2905  ;;  %2911 = vpow2.f32 %v1048_v2 }
 0x543   : > { %v2908_v56 = vpop.eup %2907  ;;  %v1052_v57 = vsel %vm380_vm2, %v2906_v55, 0.0 }
 0x544   : > { %v1055_v58 = vsel %vm380_vm2, %v2908_v56, 0.0  ;;  %1053 = vadd.xlane.f32.xlu1 %v1052_v57 }
 0x545   : > { %1056 = vadd.xlane.f32.xlu0 %v1055_v58 }
 0x54e   : > { %v2910_v3 = vpop.eup %2909 }
 0x54f   : > { %v2912_v4 = vpop.eup %2911  ;;  %v1061_v7 = vsel %vm380_vm2, %v2910_v3, 0.0 }
 0x550   : > { %v1058_v9 = vsel %vm380_vm2, %v2912_v4, 0.0 }
 0x555   : > { %1172 = vrot.lane.b32.xlu1 %v3311_v13, %s3117_s28 }
 0x559   : > { %1220 = vrot.lane.b32.xlu1 %v3316_v19, %s3117_s28 }
 0x55b   : > { %1124 = vrot.lane.b32.xlu0 %v3319_v21, %s3117_s28  ;;  %s2485_s28 = sshll.u32 %s3180_s22, 9  ;;  %s2311_s22 = scalar_lea.sflag [#allocation4], %s3286_s16 }
 0x57a   : > { %1062 = vadd.xlane.f32.xlu0 %v1061_v7 }
 0x57d   : > { %1059 = vadd.xlane.f32.xlu1 %v1058_v9 }
 0x58e   : > { %1320 = vrot.lane.b32.xlu1 %v3319_v21, %s3118_s6 }
 0x590   : > { %1270 = vrot.lane.b32.xlu0 %v3313_v16, %s3118_s6 }
 0x592   : > { %1318 = vrot.lane.b32.xlu1 %v3319_v21, %s3119_s7 }
 0x594   : > { %1268 = vrot.lane.b32.xlu0 %v3313_v16, %s3119_s7 }
 0x596   : > { %1420 = vrot.lane.b32.xlu1 %v3316_v19, %s3118_s6 }
 0x598   : > { %1370 = vrot.lane.b32.xlu0 %v3311_v13, %s3118_s6 }
 0x59a   : > { %1418 = vrot.lane.b32.xlu1 %v3316_v19, %s3119_s7 }
 0x59c   : > { %1368 = vrot.lane.b32.xlu0 %v3311_v13, %s3119_s7  ;;  %s3653_s7 = scalar_lea.hbm %s3703_s5, %s2485_s28 }
 0x5cd   : > { %v1054_v10 = vpop.xlane.xlu1 %1053 }
 0x5ce   : > { %2913 = vrcp.f32 %v1054_v10  ;;  %v1057_v11 = vpop.xlane.xlu0 %1056 }
 0x5cf   : > { %2915 = vrcp.f32 %v1057_v11 }
 0x5d1   : > { %v1173_v15 = vpop.permute.xlu1 %1172 }
 0x5d2   : > { %v1125_v12 = vpop.permute.xlu0 %1124  ;;  %v1178_v26 = vsel %vm632_vm4, %v1173_v15, 0 }
 0x5d3   : > { %v1130_v14 = vsel %vm632_vm4, %v1125_v12, 0 }
 0x5d4   : > { %2645 = vmatpush3.bf16.msra.mxu0 %v1130_v14 }
 0x5d5   : > { %2656 = vmatprep.subr.bf16.mxu0 %v3110_v8  ;;  %v1221_v23 = vpop.permute.xlu1 %1220 }
 0x5d6   : > { %v1226_v27 = vsel %vm632_vm4, %v1221_v23, 0 }
 0x5db   : > { %v2914_v17 = vpop.eup %2913 }
 0x5dc   : > { %v2916_v18 = vpop.eup %2915  ;;  %v1068_v20 = vmul.f32 %v2914_v17, %v2906_v55 }
 0x5dd   : > { %v1069_v22 = vmul.f32 %v2916_v18, %v2908_v56 }
 0x5de   : > { %v1072_v24 = vpack.c.bf16 %v1068_v20, %v1068_v20 }
 0x5df   : > { %v1073_v25 = vpack.c.bf16 %v1069_v22, %v1069_v22 }
 0x5e0   : > { %2641 = vmatmul.mubr.msk.bf16.vlgmr.msra.gmra.mxu1 %vm380_vm2, %v1072_v24 }
 0x5e1   : > { %2647 = vmatmul.mubr.msk.bf16.vlgmr.msra.gmra.mxu0 %vm380_vm2, %v1073_v25  ;;  %2651 = vmatpush3.bf16.msra.mxu1 %v1178_v26 }
 0x5e2   : > { %2657 = vmatpush3.bf16.msra.mxu0 %v1226_v27  ;;  %2658 = vmatprep.mubr.msk.bf16.mxu0 %vm3111_vm1, %v3110_v8 }
 0x5e3   : > { %2668 = vmatprep.subr.bf16.mxu0 %v3110_v8  ;;  %2652 = vmatprep.mubr.msk.bf16.mxu1 %vm3111_vm1, %v3110_v8 }
 0x5e4   : > { %2662 = vmatprep.subr.bf16.mxu1 %v3110_v8 }
 0x603   : > { %v1063_v28 = vpop.xlane.xlu0 %1062 }
 0x604   : > { %2917 = vrcp.f32 %v1063_v28 }
 0x606   : > { %v1060_v29 = vpop.xlane.xlu1 %1059 }
 0x607   : > { %2919 = vrcp.f32 %v1060_v29  ;;  %v1271_v32 = vpop.permute.xlu0 %1270 }
 0x608   : > { %v1276_v42 = vsel %vm380_vm2, %v1271_v32, 0 }
 0x60a   : > { %v1321_v30 = vpop.permute.xlu1 %1320 }
 0x60b   : > { %v1326_v39 = vsel %vm380_vm2, %v1321_v30, 0  ;;  %v1269_v41 = vpop.permute.xlu0 %1268 }
 0x60e   : > { %v1319_v37 = vpop.permute.xlu1 %1318 }
 0x60f   : > { %v1371_v44 = vpop.permute.xlu0 %1370 }
 0x610   : > { %v1376_v46 = vsel %vm380_vm2, %v1371_v44, 0 }
 0x611   : > { %v2918_v31 = vpop.eup %2917 }
 0x612   : > { %v1071_v33 = vmul.f32 %v2918_v31, %v2910_v3  ;;  %v1421_v43 = vpop.permute.xlu1 %1420 }
 0x613   : > { %v1426_v45 = vsel %vm380_vm2, %v1421_v43, 0  ;;  %v1369_v48 = vpop.permute.xlu0 %1368 }
 0x614   : > { %v2920_v34 = vpop.eup %2919  ;;  %v1075_v36 = vpack.c.bf16 %v1071_v33, %v1071_v33 }
 0x615   : > { %v1070_v38 = vmul.f32 %v2920_v34, %v2912_v4 }
 0x616   : > { %2659 = vmatmul.mubr.msk.bf16.vlgmr.msra.gmra.mxu0 %vm380_vm2, %v1075_v36  ;;  %v1419_v47 = vpop.permute.xlu1 %1418 }
 0x617   : > { %2669 = vmatpush3.bf16.xpose.msra.mxu0 %v1326_v39  ;;  %v1074_v40 = vpack.c.bf16 %v1070_v38, %v1070_v38  ;;  %2670 = vmatprep.mubr.msk.bf16.mxu0 %vm3111_vm1, %v3110_v8 }
 0x618   : > { %2680 = vmatprep.subr.bf16.mxu0 %v3110_v8 }
 0x619   : > { %2653 = vmatmul.mubr.msk.bf16.vlgmr.msra.gmra.mxu1 %vm380_vm2, %v1074_v40 }
 0x61a   : > { %2663 = vmatpush3.bf16.xpose.msra.mxu1 %v1276_v42  ;;  %2664 = vmatprep.mubr.msk.bf16.mxu1 %vm3111_vm1, %v3110_v8 }
 0x61b   : > { %2674 = vmatprep.subr.bf16.mxu1 %v3110_v8 }
 0x61e   : > { %2671 = vmatmul.mubr.msk.bf16.vlgmr.msra.gmra.mxu0 %vm380_vm2, %v1319_v37 }
 0x61f   : > { %2681 = vmatpush3.bf16.xpose.msra.mxu0 %v1426_v45  ;;  %2682 = vmatprep.mubr.msk.bf16.mxu0 %vm3111_vm1, %v3110_v8 }
 0x620   : > { %2692 = vmatprep.subr.bf16.mxu0 %v3110_v8 }
 0x621   : > { %2665 = vmatmul.mubr.msk.bf16.vlgmr.msra.gmra.mxu1 %vm380_vm2, %v1269_v41 }
 0x622   : > { %2675 = vmatpush3.bf16.xpose.msra.mxu1 %v1376_v46  ;;  %2676 = vmatprep.mubr.msk.bf16.mxu1 %vm3111_vm1, %v3110_v8 }
 0x623   : > { %2686 = vmatprep.subr.bf16.mxu1 %v3110_v8 }
 0x626   : > { %2683 = vmatmul.mubr.msk.bf16.vlgmr.msra.gmra.mxu0 %vm380_vm2, %v1419_v47 }
 0x627   : > { %2694 = vmatprep.mubr.msk.bf16.mxu0 %vm3111_vm1, %v3110_v8 }
 0x629   : > { %2677 = vmatmul.mubr.msk.bf16.vlgmr.msra.gmra.mxu1 %vm380_vm2, %v1369_v48 }
 0x62a   : > { %2688 = vmatprep.mubr.msk.bf16.mxu1 %vm3111_vm1, %v3110_v8 }
 0x6a0   : > { %v3485_v49 = vpop.f32.mrf.mxu1 }
 0x6a1   : > { %v3487_v50 = vpop.f32.mrf.mxu0 }
 0x6a2   : > { %v2855_v51 = vpack.i.bf16 %v3487_v50, %v3485_v49  ;;  %v2642_v52 = vpop.f32.mrf.mxu1 }
 0x6a3   : > { %v2648_v53 = vpop.f32.mrf.mxu0 }
 0x6a4   : > { %v1121_v54 = vpop.f32.mrf.mxu1 }
 0x6a5   : > { %v1169_v55 = vpop.f32.mrf.mxu0 }
 0x6a6   : > { %v2643_v56 = vpop.f32.mrf.mxu1 }
 0x6a7   : > { %v2649_v57 = vpop.f32.mrf.mxu0 }
 0x6d6   : > { %v3491_v58 = vpop.f32.mrf.mxu0 }
 0x6d8   : > { %v2660_v59 = vpop.f32.mrf.mxu0 }
 0x6d9   : > { %v3493_v60 = vpop.f32.mrf.mxu1 }
 0x6da   : > { %v2860_v62 = vpack.i.bf16 %v3491_v58, %v3493_v60  ;;  %v1265_v63 = vpop.f32.mrf.mxu0 }
 0x6db   : > { %v2654_v1 = vpop.f32.mrf.mxu1 }
 0x6dc   : > { %v2661_v2 = vpop.f32.mrf.mxu0 }
 0x6dd   : > { %v1217_v3 = vpop.f32.mrf.mxu1 }
 0x6de   : > { %v1362_v4 = vpop.f32.mrf.mxu0 }
 0x6df   : > { %v1469_v7 = vmul.f32 0.35355338, %v1362_v4  ;;  %v2655_v9 = vpop.f32.mrf.mxu1 }
 0x6e0   : > { %v2672_v10 = vpop.f32.mrf.mxu0 }
 0x6e1   : > { %v1312_v11 = vpop.f32.mrf.mxu1  ;;  %v1473_v12 = vadd.f32 %v1469_v7, %v3347_v35 }
 0x6e2   : > { %v1468_v14 = vmul.f32 0.35355338, %v1312_v11  ;;  %v1365_v15 = vpop.f32.mrf.mxu0 }
 0x6e3   : > { %v1479_v17 = vsel %vm380_vm2, %v1473_v12, -inf  ;;  %v2666_v18 = vpop.f32.mrf.mxu1 }
 0x6e4   : > { %1480 = vmax.xlane.f32.xlu1 %v1479_v17  ;;  %v2673_v20 = vpop.f32.mrf.mxu0  ;;  %v1472_v22 = vadd.f32 %v1468_v14, %v3347_v35 }
 0x6e5   : > { %v1315_v23 = vpop.f32.mrf.mxu1 }
 0x6e6   : > { %v1462_v24 = vpop.f32.mrf.mxu0  ;;  %v1476_v25 = vsel %vm380_vm2, %v1472_v22, -inf }
 0x6e7   : > { %1477 = vmax.xlane.f32.xlu0 %v1476_v25  ;;  %v2667_v26 = vpop.f32.mrf.mxu1  ;;  %v1471_v29 = vmul.f32 0.35355338, %v1462_v24 }
 0x6e8   : > { %v2684_v27 = vpop.f32.mrf.mxu0 }
 0x6e9   : > { %v1412_v28 = vpop.f32.mrf.mxu1  ;;  %v1475_v38 = vadd.f32 %v1471_v29, %v3347_v35 }
 0x6ea   : > { %v1470_v30 = vmul.f32 0.35355338, %v1412_v28  ;;  %v1465_v31 = vpop.f32.mrf.mxu0 }
 0x6eb   : > { %v2678_v32 = vpop.f32.mrf.mxu1  ;;  %v1485_v40 = vsel %vm380_vm2, %v1475_v38, -inf }
 0x6ec   : > { %v2685_v33 = vpop.f32.mrf.mxu0  ;;  %v1474_v34 = vadd.f32 %v1470_v30, %v3347_v35 }
 0x6ed   : > { %v1415_v36 = vpop.f32.mrf.mxu1 }
 0x6ee   : > { %v1482_v37 = vsel %vm380_vm2, %v1474_v34, -inf }
 0x6ef   : > { %1483 = vmax.xlane.f32.xlu0 %v1482_v37  ;;  %v2679_v39 = vpop.f32.mrf.mxu1 }
 0x6f3   : > { %1486 = vmax.xlane.f32.xlu0 %v1485_v40 }
 0x6f5   : > { %1524 = vrot.lane.b32.xlu1 %v3313_v16, %s3120_s9 }
 0x76d   : > { %v1481_v41 = vpop.xlane.xlu1 %1480 }
 0x76e   : > { %v1489_v42 = vsub.f32 %v1473_v12, %v1481_v41 }
 0x770   : > { %v1494_v43 = vmul.f32 1.442695, %v1489_v42  ;;  %v1478_v44 = vpop.xlane.xlu0 %1477 }
 0x771   : > { %v1525_v45 = vpop.permute.xlu1 %1524  ;;  %v1488_v46 = vsub.f32 %v1472_v22, %v1478_v44 }
 0x772   : > { %2921 = vpow2.f32 %v1494_v43  ;;  %v1530_v47 = vsel %vm632_vm4, %v1525_v45, 0 }
 0x773   : > { %v1492_v48 = vmul.f32 1.442695, %v1488_v46  ;;  %2687 = vmatpush3.bf16.msra.mxu1 %v1530_v47 }
 0x774   : > { %2698 = vmatprep.subr.bf16.mxu1 %v3110_v8 }
 0x775   : > { %2923 = vpow2.f32 %v1492_v48 }
 0x778   : > { %v1484_v56 = vpop.xlane.xlu0 %1483 }
 0x779   : > { %v1490_v1 = vsub.f32 %v1474_v34, %v1484_v56 }
 0x77b   : > { %v1496_v2 = vmul.f32 1.442695, %v1490_v1 }
 0x77c   : > { %v1487_v57 = vpop.xlane.xlu0 %1486 }
 0x77d   : > { %v1491_v59 = vsub.f32 %v1475_v38, %v1487_v57 }
 0x77f   : > { %v2922_v52 = vpop.eup %2921  ;;  %v1498_v63 = vmul.f32 1.442695, %v1491_v59 }
 0x780   : > { %v1503_v53 = vsel %vm380_vm2, %v2922_v52, 0.0 }
 0x781   : > { %1504 = vadd.xlane.f32.xlu0 %v1503_v53  ;;  %2925 = vpow2.f32 %v1498_v63 }
 0x782   : > { %v2924_v54 = vpop.eup %2923  ;;  %2927 = vpow2.f32 %v1496_v2 }
 0x783   : > { %v1500_v55 = vsel %vm380_vm2, %v2924_v54, 0.0 }
 0x784   : > { %1501 = vadd.xlane.f32.xlu1 %v1500_v55 }
 0x78e   : > { %v2926_v3 = vpop.eup %2925 }
 0x78f   : > { %v1509_v4 = vsel %vm380_vm2, %v2926_v3, 0.0  ;;  %v2928_v7 = vpop.eup %2927 }
 0x790   : > { %v1506_v9 = vsel %vm380_vm2, %v2928_v7, 0.0 }
 0x795   : > { %1620 = vrot.lane.b32.xlu1 %v3311_v13, %s3120_s9 }
 0x797   : > { %1572 = vrot.lane.b32.xlu0 %v3319_v21, %s3120_s9 }
 0x799   : > { %1668 = vrot.lane.b32.xlu1 %v3316_v19, %s3120_s9  ;;  %s3033_s9 = scalar_lea.vmem %s3647_s12, 512 }
 0x79a   : > { %p3034_p11 = scmp.ne.s32.totalorder %s3647_s12, %s3033_s9 }
 0x79c   : > { %p3035_p1 = pnand %p3034_p11, %p3719_p10 }
 0x79e   : > { %p3036_p2 = pneg %p3035_p1 }
 0x7b6   : > { %1510 = vadd.xlane.f32.xlu0 %v1509_v4 }
 0x7bd   : > { %1507 = vadd.xlane.f32.xlu1 %v1506_v9 }
 0x7cc   : > { %1718 = vrot.lane.b32.xlu0 %v3313_v16, %s3121_s13 }
 0x7ce   : > { %1768 = vrot.lane.b32.xlu1 %v3319_v21, %s3121_s13 }
 0x7d0   : > { %1716 = vrot.lane.b32.xlu0 %v3313_v16, %s3122_s14 }
 0x7d2   : > { %1766 = vrot.lane.b32.xlu1 %v3319_v21, %s3122_s14 }
 0x7d4   : > { %1818 = vrot.lane.b32.xlu0 %v3311_v13, %s3121_s13 }
 0x7d6   : > { %1868 = vrot.lane.b32.xlu1 %v3316_v19, %s3121_s13  ;;  %s3127_s13 = smov [#allocation8]  }
 0x7d8   : > { %1816 = vrot.lane.b32.xlu0 %v3311_v13, %s3122_s14 }
 0x7da   : > { %1866 = vrot.lane.b32.xlu1 %v3316_v19, %s3122_s14  ;;  %s3037_s14 = sshll.u32 %s3127_s13, 4  ;;  %s3038_s14 = int_to_ptr.vmem [resolvable:$false] %s3037_s14 }
 0x7db   : > { %p3040_p6 = scmp.lt.s32.totalorder %s3647_s12, %s3038_s14 }
 0x80a   : > { %v1505_v10 = vpop.xlane.xlu0 %1504 }
 0x80b   : > { %2929 = vrcp.f32 %v1505_v10 }
 0x80d   : > { %v1502_v11 = vpop.xlane.xlu1 %1501 }
 0x80e   : > { %2931 = vrcp.f32 %v1502_v11  ;;  %v1573_v12 = vpop.permute.xlu0 %1572 }
 0x80f   : > { %v1578_v14 = vsel %vm632_vm4, %v1573_v12, 0 }
 0x810   : > { %2693 = vmatpush3.bf16.msra.mxu0 %v1578_v14 }
 0x811   : > { %2704 = vmatprep.subr.bf16.mxu0 %v3110_v8  ;;  %v1621_v15 = vpop.permute.xlu1 %1620 }
 0x812   : > { %v1626_v27 = vsel %vm632_vm4, %v1621_v15, 0 }
 0x815   : > { %v1669_v20 = vpop.permute.xlu1 %1668 }
 0x816   : > { %v1674_v25 = vsel %vm632_vm4, %v1669_v20, 0 }
 0x818   : > { %v2930_v17 = vpop.eup %2929 }
 0x819   : > { %v1517_v18 = vmul.f32 %v2930_v17, %v2922_v52 }
 0x81b   : > { %v2932_v22 = vpop.eup %2931  ;;  %v1521_v23 = vpack.c.bf16 %v1517_v18, %v1517_v18 }
 0x81c   : > { %v1516_v24 = vmul.f32 %v2932_v22, %v2924_v54 }
 0x81d   : > { %2695 = vmatmul.mubr.msk.bf16.vlgmr.msra.gmra.mxu0 %vm380_vm2, %v1521_v23 }
 0x81e   : > { %2705 = vmatpush3.bf16.msra.mxu0 %v1674_v25  ;;  %v1520_v26 = vpack.c.bf16 %v1516_v24, %v1516_v24  ;;  %2706 = vmatprep.mubr.msk.bf16.mxu0 %vm3111_vm1, %v3110_v8 }
 0x81f   : > { %2716 = vmatprep.subr.bf16.mxu0 %v3110_v8 }
 0x820   : > { %2689 = vmatmul.mubr.msk.bf16.vlgmr.msra.gmra.mxu1 %vm380_vm2, %v1520_v26 }
 0x821   : > { %2699 = vmatpush3.bf16.msra.mxu1 %v1626_v27  ;;  %2700 = vmatprep.mubr.msk.bf16.mxu1 %vm3111_vm1, %v3110_v8 }
 0x822   : > { %2710 = vmatprep.subr.bf16.mxu1 %v3110_v8 }
 0x83f   : > { %v1511_v28 = vpop.xlane.xlu0 %1510 }
 0x840   : > { %2933 = vrcp.f32 %v1511_v28 }
 0x843   : > { %v1719_v36 = vpop.permute.xlu0 %1718 }
 0x844   : > { %v1724_v43 = vsel %vm380_vm2, %v1719_v36, 0 }
 0x846   : > { %v1508_v29 = vpop.xlane.xlu1 %1507 }
 0x847   : > { %2935 = vrcp.f32 %v1508_v29  ;;  %v1717_v42 = vpop.permute.xlu0 %1716 }
 0x84a   : > { %v1769_v30 = vpop.permute.xlu1 %1768 }
 0x84b   : > { %v1774_v37 = vsel %vm380_vm2, %v1769_v30, 0  ;;  %v1819_v45 = vpop.permute.xlu0 %1818 }
 0x84c   : > { %v1824_v46 = vsel %vm380_vm2, %v1819_v45, 0 }
 0x84d   : > { %v2934_v31 = vpop.eup %2933 }
 0x84e   : > { %v1519_v32 = vmul.f32 %v2934_v31, %v2926_v3  ;;  %v1767_v34 = vpop.permute.xlu1 %1766 }
 0x84f   : > { %v1817_v48 = vpop.permute.xlu0 %1816 }
 0x850   : > { %v1523_v33 = vpack.c.bf16 %v1519_v32, %v1519_v32 }
 0x852   : > { %2707 = vmatmul.mubr.msk.bf16.vlgmr.msra.gmra.mxu0 %vm380_vm2, %v1523_v33  ;;  %v1869_v40 = vpop.permute.xlu1 %1868 }
 0x853   : > { %2717 = vmatpush3.bf16.xpose.msra.mxu0 %v1774_v37  ;;  %2718 = vmatprep.mubr.msk.bf16.mxu0 %vm3111_vm1, %v3110_v8  ;;  %v1874_v44 = vsel %vm380_vm2, %v1869_v40, 0 }
 0x854   : > { %v2936_v38 = vpop.eup %2935  ;;  %2728 = vmatprep.subr.bf16.mxu0 %v3110_v8 }
 0x855   : > { %v1518_v39 = vmul.f32 %v2936_v38, %v2928_v7 }
 0x856   : > { %v1867_v47 = vpop.permute.xlu1 %1866 }
 0x857   : > { %v1522_v41 = vpack.c.bf16 %v1518_v39, %v1518_v39 }
 0x859   : > { %2701 = vmatmul.mubr.msk.bf16.vlgmr.msra.gmra.mxu1 %vm380_vm2, %v1522_v41 }
 0x85a   : > { %2711 = vmatpush3.bf16.xpose.msra.mxu1 %v1724_v43  ;;  %2719 = vmatmul.mubr.msk.bf16.vlgmr.msra.gmra.mxu0 %vm380_vm2, %v1767_v34 }
 0x85b   : > { %2729 = vmatpush3.bf16.xpose.msra.mxu0 %v1874_v44  ;;  %2712 = vmatprep.mubr.msk.bf16.mxu1 %vm3111_vm1, %v3110_v8 }
 0x85c   : > { %2722 = vmatprep.subr.bf16.mxu1 %v3110_v8  ;;  %2730 = vmatprep.mubr.msk.bf16.mxu0 %vm3111_vm1, %v3110_v8 }
 0x85d   : > { %2740 = vmatprep.subr.bf16.mxu0 %v3110_v8 }
 0x861   : > { %2713 = vmatmul.mubr.msk.bf16.vlgmr.msra.gmra.mxu1 %vm380_vm2, %v1717_v42 }
 0x862   : > { %2723 = vmatpush3.bf16.xpose.msra.mxu1 %v1824_v46  ;;  %2731 = vmatmul.mubr.msk.bf16.vlgmr.msra.gmra.mxu0 %vm380_vm2, %v1867_v47 }
 0x863   : > { %2724 = vmatprep.mubr.msk.bf16.mxu1 %vm3111_vm1, %v3110_v8  ;;  %2734 = vmatprep.subr.bf16.mxu1 %v3110_v8 }
 0x864   : > { %2742 = vmatprep.mubr.msk.bf16.mxu0 %vm3111_vm1, %v3110_v8 }
 0x869   : > { %2725 = vmatmul.mubr.msk.bf16.vlgmr.msra.gmra.mxu1 %vm380_vm2, %v1817_v48 }
 0x86a   : > { %2736 = vmatprep.mubr.msk.bf16.mxu1 %vm3111_vm1, %v3110_v8 }
 0x8dd   : > { %v3561_v52 = vpop.f32.mrf.mxu0 }
 0x8df   : > { %v2696_v53 = vpop.f32.mrf.mxu0 }
 0x8e0   : > { %v3563_v54 = vpop.f32.mrf.mxu1 }
 0x8e1   : > { %v2865_v55 = vpack.i.bf16 %v3561_v52, %v3563_v54  ;;  %v1617_v56 = vpop.f32.mrf.mxu0 }
 0x8e2   : > { %v2690_v57 = vpop.f32.mrf.mxu1 }
 0x8e3   : > { %v2697_v59 = vpop.f32.mrf.mxu0 }
 0x8e4   : > { %v1569_v63 = vpop.f32.mrf.mxu1 }
 0x8e6   : > { %v2691_v1 = vpop.f32.mrf.mxu1 }
 0x912   : > { %v3567_v2 = vpop.f32.mrf.mxu0 }
 0x914   : > { %v2708_v3 = vpop.f32.mrf.mxu0 }
 0x916   : > { %v1713_v4 = vpop.f32.mrf.mxu0 }
 0x918   : > { %v2709_v7 = vpop.f32.mrf.mxu0 }
 0x919   : > { %v3569_v9 = vpop.f32.mrf.mxu1 }
 0x91a   : > { %v2870_v10 = vpack.i.bf16 %v3567_v2, %v3569_v9  ;;  %v1810_v11 = vpop.f32.mrf.mxu0 }
 0x91b   : > { %v1917_v12 = vmul.f32 0.35355338, %v1810_v11  ;;  %v2702_v14 = vpop.f32.mrf.mxu1 }
 0x91c   : > { %v2720_v15 = vpop.f32.mrf.mxu0 }
 0x91d   : > { %v1665_v17 = vpop.f32.mrf.mxu1  ;;  %v1921_v18 = vadd.f32 %v1917_v12, %v3347_v35 }
 0x91e   : > { %v1813_v20 = vpop.f32.mrf.mxu0 }
 0x91f   : > { %v2703_v22 = vpop.f32.mrf.mxu1  ;;  %v1927_v23 = vsel %vm380_vm2, %v1921_v18, -inf }
 0x920   : > { %1928 = vmax.xlane.f32.xlu1 %v1927_v23  ;;  %v2721_v24 = vpop.f32.mrf.mxu0 }
 0x921   : > { %v1760_v25 = vpop.f32.mrf.mxu1 }
 0x922   : > { %v1916_v26 = vmul.f32 0.35355338, %v1760_v25  ;;  %v1910_v27 = vpop.f32.mrf.mxu0 }
 0x923   : > { %v2714_v28 = vpop.f32.mrf.mxu1  ;;  %v1919_v38 = vmul.f32 0.35355338, %v1910_v27 }
 0x924   : > { %v2732_v29 = vpop.f32.mrf.mxu0  ;;  %v1920_v30 = vadd.f32 %v1916_v26, %v3347_v35 }
 0x925   : > { %v1763_v31 = vpop.f32.mrf.mxu1  ;;  %v1923_v44 = vadd.f32 %v1919_v38, %v3347_v35 }
 0x926   : > { %v1913_v32 = vpop.f32.mrf.mxu0  ;;  %v1924_v33 = vsel %vm380_vm2, %v1920_v30, -inf  ;;  %v2887_v31 = vld [vmem:[#allocation7 + $0x8] sm:$0xff]  }
 0x927   : > { %1925 = vmax.xlane.f32.xlu0 %v1924_v33  ;;  %v2715_v34 = vpop.f32.mrf.mxu1  ;;  %v1933_v46 = vsel %vm380_vm2, %v1923_v44, -inf }
 0x928   : > { %v2733_v36 = vpop.f32.mrf.mxu0 }
 0x929   : > { %v1860_v37 = vpop.f32.mrf.mxu1 }
 0x92a   : > { %v1918_v39 = vmul.f32 0.35355338, %v1860_v37  ;;  %v2888_v37 = vld [vmem:[#allocation7] sm:$0xff]  }
 0x92b   : > { %v2726_v40 = vpop.f32.mrf.mxu1 }
 0x92c   : > { %v1922_v41 = vadd.f32 %v1918_v39, %v3347_v35 }
 0x92d   : > { %v1863_v42 = vpop.f32.mrf.mxu1 }
 0x92e   : > { %v1930_v43 = vsel %vm380_vm2, %v1922_v41, -inf }
 0x92f   : > { %1931 = vmax.xlane.f32.xlu0 %v1930_v43  ;;  %v2727_v45 = vpop.f32.mrf.mxu1 }
 0x931   : > { %1972 = vrot.lane.b32.xlu1 %v3313_v16, %s3123_s29 }
 0x933   : > { %1934 = vmax.xlane.f32.xlu0 %v1933_v46 }
 0x9a9   : > { %v1929_v47 = vpop.xlane.xlu1 %1928 }
 0x9aa   : > { %v1937_v48 = vsub.f32 %v1921_v18, %v1929_v47 }
 0x9ac   : > { %v1942_v53 = vmul.f32 1.442695, %v1937_v48 }
 0x9ad   : > { %v1973_v56 = vpop.permute.xlu1 %1972 }
 0x9ae   : > { %2937 = vpow2.f32 %v1942_v53  ;;  %v1978_v57 = vsel %vm632_vm4, %v1973_v56, 0 }
 0x9af   : > { %2735 = vmatpush3.bf16.msra.mxu1 %v1978_v57 }
 0x9b0   : > { %v1926_v59 = vpop.xlane.xlu0 %1925  ;;  %2746 = vmatprep.subr.bf16.mxu1 %v3110_v8 }
 0x9b1   : > { %v1936_v35 = vsub.f32 %v1920_v30, %v1926_v59 }
 0x9b3   : > { %v1940_v63 = vmul.f32 1.442695, %v1936_v35 }
 0x9b5   : > { %2939 = vpow2.f32 %v1940_v63 }
 0x9b8   : > { %v1932_v1 = vpop.xlane.xlu0 %1931 }
 0x9b9   : > { %v1938_v3 = vsub.f32 %v1922_v41, %v1932_v1 }
 0x9bb   : > { %v2938_v16 = vpop.eup %2937  ;;  %v1944_v4 = vmul.f32 1.442695, %v1938_v3 }
 0x9bc   : > { %v1951_v7 = vsel %vm380_vm2, %v2938_v16, 0.0  ;;  %v1935_v11 = vpop.xlane.xlu0 %1934 }
 0x9bd   : > { %2941 = vpow2.f32 %v1944_v4  ;;  %1952 = vadd.xlane.f32.xlu0 %v1951_v7  ;;  %v1939_v12 = vsub.f32 %v1923_v44, %v1935_v11 }
 0x9bf   : > { %v1946_v14 = vmul.f32 1.442695, %v1939_v12 }
 0x9c1   : > { %2943 = vpow2.f32 %v1946_v14 }
 0x9c2   : > { %v2940_v15 = vpop.eup %2939 }
 0x9c3   : > { %v1948_v17 = vsel %vm380_vm2, %v2940_v15, 0.0 }
 0x9c4   : > { %1949 = vadd.xlane.f32.xlu1 %v1948_v17 }
 0x9ca   : > { %v2942_v18 = vpop.eup %2941 }
 0x9cb   : > { %v1954_v20 = vsel %vm380_vm2, %v2942_v18, 0.0 }
 0x9cc   : > { %1955 = vadd.xlane.f32.xlu1 %v1954_v20 }
 0x9ce   : > { %v2944_v22 = vpop.eup %2943 }
 0x9cf   : > { %v1957_v23 = vsel %vm380_vm2, %v2944_v22, 0.0 }
 0x9d0   : > { %1958 = vadd.xlane.f32.xlu0 %v1957_v23 }
 0x9dd   : > { %2068 = vrot.lane.b32.xlu1 %v3311_v13, %s3123_s29 }
 0x9e1   : > { %2116 = vrot.lane.b32.xlu1 %v3316_v19, %s3123_s29 }
 0x9e5   : > { %2861 = vrot.lane.b32.xlu1 %v2860_v62, %s3124_s30 }
 0x9e6   : > { %2020 = vrot.lane.b32.xlu0 %v3319_v21, %s3123_s29  ;;  %s3039_s29 = scalar_lea.vmem %s3038_s14, 1024 }
 0x9e7   : > { %p3041_p12 = scmp.lt.s32.totalorder %s3039_s29, %s3033_s9 }
 0x9e9   : > { %2871 = vrot.lane.b32.xlu1 %v2870_v10, %s3125_s24  ;;  %p3042_p7 = por %p3041_p12, %p3040_p6 }
 0x9ea   : > { %2856 = vrot.lane.b32.xlu0 %v2855_v51, %s3124_s30 }
 0x9eb   : > { %p3043_p9 = pnand %p3042_p7, %p3036_p2 }
 0x9ee   : > { %2866 = vrot.lane.b32.xlu0 %v2865_v55, %s3125_s24 }
 0xa46   : > { %v1953_v13 = vpop.xlane.xlu0 %1952 }
 0xa47   : > { %2945 = vrcp.f32 %v1953_v13 }
 0xa4d   : > { %v1950_v19 = vpop.xlane.xlu1 %1949 }
 0xa4e   : > { %2947 = vrcp.f32 %v1950_v19 }
 0xa54   : > { %v2946_v21 = vpop.eup %2945 }
 0xa55   : > { %v1956_v58 = vpop.xlane.xlu1 %1955  ;;  %v1965_v10 = vmul.f32 %v2946_v21, %v2938_v16 }
 0xa56   : > { %2949 = vrcp.f32 %v1956_v58 }
 0xa57   : > { %v1969_v54 = vpack.c.bf16 %v1965_v10, %v1965_v10 }
 0xa59   : > { %v2069_v60 = vpop.permute.xlu1 %2068  ;;  %v1959_v62 = vpop.xlane.xlu0 %1958 }
 0xa5a   : > { %2951 = vrcp.f32 %v1959_v62  ;;  %v2074_v52 = vsel %vm632_vm4, %v2069_v60, 0 }
 0xa5b   : > { %v2948_v2 = vpop.eup %2947 }
 0xa5c   : > { %v1964_v9 = vmul.f32 %v2948_v2, %v2940_v15 }
 0xa5d   : > { %v2021_v24 = vpop.permute.xlu0 %2020  ;;  %v2117_v51 = vpop.permute.xlu1 %2116 }
 0xa5e   : > { %v2026_v49 = vsel %vm632_vm4, %v2021_v24, 0  ;;  %v1968_v50 = vpack.c.bf16 %v1964_v9, %v1964_v9  ;;  %v2122_v55 = vsel %vm632_vm4, %v2117_v51, 0 }
 0xa5f   : > { %2741 = vmatpush3.bf16.msra.mxu0 %v2026_v49 }
 0xa60   : > { %2737 = vmatmul.mubr.msk.bf16.vlgmr.msra.gmra.mxu1 %vm380_vm2, %v1968_v50  ;;  %2752 = vmatprep.subr.bf16.mxu0 %v3110_v8 }
 0xa61   : > { %2747 = vmatpush3.bf16.msra.mxu1 %v2074_v52  ;;  %2748 = vmatprep.mubr.msk.bf16.mxu1 %vm3111_vm1, %v3110_v8  ;;  %v2857_v57 = vpop.permute.xlu0 %2856  ;;  %v2862_v16 = vpop.permute.xlu1 %2861 }
 0xa62   : > { %2743 = vmatmul.mubr.msk.bf16.vlgmr.msra.gmra.mxu0 %vm380_vm2, %v1969_v54  ;;  %2758 = vmatprep.subr.bf16.mxu1 %v2887_v31  ;;  %v2859_v35 = vunpack.i.h.bf16 %v2857_v57  ;;  %v2858_v63 = vunpack.i.l.bf16 %v2857_v57  ;;  %v2864_v13 = vunpack.i.h.bf16 %v2862_v16  ;;  %v2863_v19 = vunpack.i.l.bf16 %v2862_v16 }
 0xa63   : > { %v2950_v25 = vpop.eup %2949  ;;  %2753 = vmatpush3.bf16.msra.mxu0 %v2122_v55  ;;  %2754 = vmatprep.mubr.msk.bf16.mxu0 %vm3111_vm1, %v3110_v8 }
 0xa64   : > { %v1966_v26 = vmul.f32 %v2950_v25, %v2942_v18  ;;  %v2213_v7 = vsel %vm380_vm2, %v3415_v0, %v2859_v35  ;;  %v2212_v11 = vsel %vm380_vm2, %v3413_v61, %v2858_v63  ;;  %v2215_v21 = vsel %vm380_vm2, %v3419_v6, %v2864_v13  ;;  %v2470_v6 = vld [vmem:[%s3702_s4] ss:$0 sm:$0xff] }
 0xa65   : > { %v2867_v59 = vpop.permute.xlu0 %2866  ;;  %v2872_v23 = vpop.permute.xlu1 %2871  ;;  %v2214_v60 = vsel %vm380_vm2, %v3417_v5, %v2863_v19 }
 0xa66   : > { %v1970_v28 = vpack.c.bf16 %v1966_v26, %v1966_v26  ;;  %v2869_v1 = vunpack.i.h.bf16 %v2867_v59  ;;  %v2868_v3 = vunpack.i.l.bf16 %v2867_v59  ;;  %v2874_v0 = vunpack.i.h.bf16 %v2872_v23 }
 0xa67   : > { %v2952_v27 = vpop.eup %2951  ;;  %v2873_v58 = vunpack.i.l.bf16 %v2872_v23 }
 0xa68   : > { %2749 = vmatmul.mubr.msk.bf16.vlgmr.msra.gmra.mxu1 %vm380_vm2, %v1970_v28  ;;  %v1967_v29 = vmul.f32 %v2952_v27, %v2944_v22  ;;  %v2217_v15 = vsel %vm2216_vm5, %v2212_v11, %v2868_v3  ;;  %v2218_v17 = vsel %vm2216_vm5, %v2213_v7, %v2869_v1  ;;  %v2220_v10 = vsel %vm2216_vm5, %v2215_v21, %v2874_v0 }
 0xa69   : > { %2759 = vmatpush3.bf16.msra.mxu1 %v2887_v31  ;;  %v2219_v9 = vsel %vm2216_vm5, %v2214_v60, %v2873_v58 }
 0xa6a   : > { %v1971_v30 = vpack.c.bf16 %v1967_v29, %v1967_v29  ;;  %2760 = vmatprep.subr.bf16.mxu1 %v2888_v37 }
 0xa6c   : > { %2755 = vmatmul.mubr.msk.bf16.vlgmr.msra.gmra.mxu0 %vm380_vm2, %v1971_v30 }
 0xa6d   : > { %2761 = vmatpush3.bf16.msra.mxu1 %v2888_v37 }
 0xb20   : > { %v2014_v32 = vpop.f32.mrf.mxu1 }
 0xb22   : > { %v2738_v33 = vpop.f32.mrf.mxu1  ;;  %v2062_v34 = vpop.f32.mrf.mxu0 }
 0xb23   : > { %v2875_v36 = vpack.i.bf16 %v2062_v34, %v2014_v32 }
 0xb24   : > { %v2017_v38 = vpop.f32.mrf.mxu1  ;;  %v2744_v39 = vpop.f32.mrf.mxu0 }
 0xb25   : > { %2876 = vrot.lane.b32.xlu0 %v2875_v36, %s3126_s26 }
 0xb26   : > { %v2739_v8 = vpop.f32.mrf.mxu1  ;;  %v2065_v40 = vpop.f32.mrf.mxu0 }
 0xb28   : > { %v2745_v41 = vpop.f32.mrf.mxu0  ;;  %v2110_v42 = vpop.f32.mrf.mxu1 }
 0xb2a   : > { %v2750_v43 = vpop.f32.mrf.mxu1 }
 0xb2c   : > { %v2113_v44 = vpop.f32.mrf.mxu1  ;;  %v2158_v45 = vpop.f32.mrf.mxu0 }
 0xb2d   : > { %v2880_v46 = vpack.i.bf16 %v2158_v45, %v2110_v42 }
 0xb2e   : > { %v2751_v47 = vpop.f32.mrf.mxu1  ;;  %v2756_v48 = vpop.f32.mrf.mxu0 }
 0xb2f   : > { %2881 = vrot.lane.b32.xlu1 %v2880_v46, %s3126_s26 }
 0xb30   : > { %v2161_v53 = vpop.f32.mrf.mxu0 }
 0xb32   : > { %v2757_v56 = vpop.f32.mrf.mxu0 }
 0xb97   : > { %v2877_v4 = vpop.permute.xlu0 %2876 }
 0xb98   : > { %v2879_v12 = vunpack.i.h.bf16 %v2877_v4  ;;  %v2878_v14 = vunpack.i.l.bf16 %v2877_v4 }
 0xb9a   : > { %v2222_v18 = vsel %vm2221_vm6, %v2217_v15, %v2878_v14  ;;  %v2223_v20 = vsel %vm2221_vm6, %v2218_v17, %v2879_v12 }
 0xb9b   : > { %v2226_v22 = vpack.c.bf16 %v2223_v20, %v2222_v18 }
 0xb9d   : > { %2762 = vmatprep.mubr.msk.bf16.mxu1 %vm304_vm0, %v2226_v22 }
 0xba1   : > { %v2882_v61 = vpop.permute.xlu1 %2881 }
 0xba2   : > { %v2884_v62 = vunpack.i.h.bf16 %v2882_v61  ;;  %v2883_v2 = vunpack.i.l.bf16 %v2882_v61 }
 0xba4   : > { %v2225_v24 = vsel %vm2221_vm6, %v2220_v10, %v2884_v62  ;;  %v2224_v49 = vsel %vm2221_vm6, %v2219_v9, %v2883_v2 }
 0xba5   : > { %v2227_v50 = vpack.c.bf16 %v2225_v24, %v2224_v49 }
 0xba7   : > { %2763 = vmatmul.mubr.msk.bf16.vlgmr.msra.gmra.mxu1 %vm304_vm0, %v2227_v50 }
 0xc67   : > { %v2764_v51 = vpop.f32.mrf.mxu1 }
 0xc68   : > { %v2300_v5 = vadd.f32 %v2764_v51, %v2470_v6 }
 0xc69   : > { %v2291_v52 = vpop.f32.mrf.mxu1 }
 0xc6a   : > { %2308 = vst.msk [vmem:[%s271_s11 + $0x10] sm:$0xff] %vm304_vm0, %v2300_v5  ;;  %v2292_v54 = vadd.f32 %v2470_v6, %v2291_v52 }
 0xc6b   : > { %v2765_v55 = vpop.f32.mrf.mxu1 }
 0xc6c   : > { %2306 = vst.msk [vmem:[%s271_s11] sm:$0xff] %vm304_vm0, %v2292_v54  ;;  %v2303_v25 = vadd.f32 %v2765_v55, %v2470_v6 }
 0xc6d   : > { %v2294_v26 = vpop.f32.mrf.mxu1 }
 0xc6e   : > { %2309 = vst.msk [vmem:[%s271_s11 + $0x18] sm:$0xff] %vm304_vm0, %v2303_v25  ;;  %v2295_v27 = vadd.f32 %v2470_v6, %v2294_v26 }
 0xc70   : > { %2307 = vst.msk [vmem:[%s271_s11 + $0x8] sm:$0xff] %vm304_vm0, %v2295_v27 }
 0xc71   : > { %3046 = shalt.err (!%p3043_p9)
}
 0xc72   : > { %s3047_s24 = scalar_lea.hbm %s3653_s7, 512  ;;  %s3051_s10 = scalar_lea.hbm %s3703_s5, 1024 }
 0xc73   : > { %p3048_p13 = scmp.ne.s32.totalorder %s3653_s7, %s3047_s24  ;;  %p3052_p4 = scmp.lt.s32.totalorder %s3653_s7, %s3703_s5 }
 0xc74   : > { %p3053_p8 = scmp.lt.s32.totalorder %s3051_s10, %s3047_s24 }
 0xc75   : > { %p3049_p5 = pnand %p3048_p13, %p3719_p10 }
 0xc76   : > { %p3054_p3 = por %p3053_p8, %p3052_p4 }
 0xc77   : > { %p3050_p0 = pneg %p3049_p5 }
 0xc79   : > { %p3055_p11 = pnand %p3054_p3, %p3050_p0 }
 0xc7b   : > { %3058 = shalt.err (!%p3055_p11)
}
 0xc7c   : > { %s3128_s17 = smov 128  }
 0xc7d   : > { %2776 = dma.vmem_to_hbm [thread:$0]  (%p3719_p10), %s3647_s12, 512, %s3653_s7, %s2311_s22, %s3128_s17, %s3128_s17, %s3124_s30  }
 0xc7e PF: > { %s2339_s6 = sand.u32 1, %s3089_s18   ;;  %p3720_p1 = scmp.ne.s32.totalorder %s3709_s25, 0 }
 0xc7f   : > { %p3721_p2 = scmp.ge.s32.totalorder %s3101_s21, 2  ;;  %s2340_s9 = scalar_lea.sflag [#allocation4], %s2339_s6 }
 0xc81   : > { %p2790_p6 = pnand %p3721_p2, %p3720_p1 }
 0xc83   : > { %p2791_p12 = pneg %p2790_p6 }
 0xc85   : > { %3084 = dma.done.wait (%p2791_p12), %s2340_s9, 512  }
 0xc86   : > { %3086 = vsyncadd (%p2791_p12), %s2340_s9, 4294966784  ;;  %p19_p7 = scmp.ge.s32.totalorder %s3231_s15, 4   ;;  %s3722_s18 = smov %s3093_s19 }
 0xc87   : > { %s3723_s19 = smov %s3097_s20  ;;  %s3724_s20 = smov %s3247_s27 }
 0xc88   : > { %s3725_s21 = smov %s3231_s15  ;;  %21 = sbr.rel (!%p19_p7) target bundleno = 6 (0x6), region = 93 }
 0xc8d   :  { %2345 = vsyncpa [#allocation3], 1 }
 0xc8e   :  { %2347 = vsyncpa [#allocation3 + $0x1], 1 }
 0xc8f   :  { %2348 = vsyncpa [#allocation6], 1 }
 0xc90   :  { %2349 = vsyncpa [#allocation4], 1 }
 0xc91   :  { %2351 = vsyncpa [#allocation4 + $0x1], 1 }

</bundles_post_ra>
